<compile_context>
chip_gen: v7x
topology: tpu7x:2x2x1
jax: 0.10.0
libtpu: 0.0.40
codegen_flags: <defaults>
</compile_context>

<pallas_src>
import functools

import jax
import jax.numpy as jnp
import numpy as np
from jax.experimental import pallas as pl
from jax.experimental.pallas import tpu as pltpu


def _nbytes(shape, dtype):
    n = 1
    for s in shape:
        n *= int(s)
    return n * jnp.dtype(dtype).itemsize


def _vmem_capacity_bytes():
    # Trace-time hardware query; fall back to the smallest per-core VMEM (v7x: 64 MiB).
    try:
        info = pltpu.get_tpu_info()
        cap = getattr(info, "vmem_capacity_bytes", None)
        if cap:
            return int(cap)
    except Exception:
        pass
    return 64 * 2 ** 20


def _pick_tq(L, vmem_cap, return_attn):
    # Query-tile length: as large as the part's VMEM permits (bigger tiles amortize the
    # ~0.35us per-step overhead); cap at 128 on 64-MiB parts when the (H, tq, L)
    # probability block must also be double-buffered.
    if vmem_cap > (96 << 20):
        max_t = 512
    else:
        max_t = 128 if return_attn else 256
    if L <= max_t:
        return L
    for t in (512, 256, 128, 64, 32, 16, 8):
        if t <= max_t and L % t == 0:
            return t
    # TODO(synk): pad L (or use a cdiv grid with in-kernel masking) for lengths with no
    # small multiple-of-8 divisor; falling back to a single full-L tile here.
    return L


def _make_kernel(n_head, d_k, d_v, tq, return_attn, heads_per_group=8, eps=1e-6):
    hc = max(1, min(heads_per_group, n_head))

    def _compute(x_ref, bias_ref,
                 wq_ref, wk_ref, wv_ref, wo_ref,
                 ln1_g_ref, ln1_b_ref,
                 w1_ref, b1_ref, w2_ref, b2_ref,
                 ln2_g_ref, ln2_b_ref,
                 out_ref, attn_ref,
                 k_sc, v_sc):
        qi = pl.program_id(1)

        # ---- K/V projections: once per batch element (the x block is resident across
        #      the query-tile axis). One fused MXU matmul each, then direct per-head
        #      stores into head-major bf16 scratch (no jnp.stack concatenate).
        # TODO(synk): hoist this projection to its own leading grid step so it overlaps
        # the first query tile's DMAs instead of lengthening the pipeline's first step.
        @pl.when(qi == 0)
        def _():
            xb = x_ref[...].astype(jnp.bfloat16)                     # (L, d_model)
            k_all = jnp.dot(xb, wk_ref[...], preferred_element_type=jnp.float32)
            v_all = jnp.dot(xb, wv_ref[...], preferred_element_type=jnp.float32)
            for h in range(n_head):
                k_sc[h] = k_all[:, h * d_k:(h + 1) * d_k].astype(jnp.bfloat16)
                v_sc[h] = v_all[:, h * d_v:(h + 1) * d_v].astype(jnp.bfloat16)

        # ---- Q projection for this query tile (1/sqrt(d_k) already folded into Wq).
        q_start = pl.multiple_of(qi * tq, tq)
        xq = x_ref[pl.ds(q_start, tq), :]                            # (TQ, d_model) f32
        q_all = jnp.dot(xq.astype(jnp.bfloat16), wq_ref[...],
                        preferred_element_type=jnp.float32)          # (TQ, H*d_k)

        # Additive mask bias (precomputed in the wrapper, shipped bf16), once per tile.
        bias = bias_ref[...].astype(jnp.float32)[None, :, :]         # (1, TQ, L)

        # ---- Attention, chunked over head groups to bound the (Hc, TQ, L) live set.
        o = xq                                                       # residual accumulator (f32)
        for g0 in range(0, n_head, hc):
            ng = min(hc, n_head - g0)
            full = (g0 == 0 and ng == n_head)

            q_grp = jnp.stack(
                [q_all[:, (g0 + i) * d_k:(g0 + i + 1) * d_k] for i in range(ng)],
                axis=0).astype(jnp.bfloat16)                         # (ng, TQ, d_k)
            k_grp = k_sc[...] if full else k_sc[pl.ds(g0, ng), :, :]  # (ng, L, d_k) bf16
            v_grp = v_sc[...] if full else v_sc[pl.ds(g0, ng), :, :]  # (ng, L, d_v) bf16

            s = jnp.einsum('hqd,hkd->hqk', q_grp, k_grp,
                           preferred_element_type=jnp.float32)       # (ng, TQ, L)
            s = s + bias
            s = s - jnp.max(s, axis=-1, keepdims=True)
            e = jnp.exp(s)
            inv = pl.reciprocal(jnp.sum(e, axis=-1, keepdims=True), approx=True)

            if return_attn:
                p = e * inv
                if full:
                    attn_ref[...] = p.astype(attn_ref.dtype)
                else:
                    attn_ref[pl.ds(g0, ng), :, :] = p.astype(attn_ref.dtype)
                ctx = jnp.einsum('hqk,hkd->hqd', p.astype(jnp.bfloat16), v_grp,
                                 preferred_element_type=jnp.float32)  # (ng, TQ, d_v)
            else:
                # Fast path: PV on unnormalized exp scores; rescale the (small) context.
                ctx = jnp.einsum('hqk,hkd->hqd', e.astype(jnp.bfloat16), v_grp,
                                 preferred_element_type=jnp.float32)
                ctx = ctx * inv

            # Output projection accumulated per head (Wo is head-major) -- no VMEM
            # context slab, no masked partial-lane stores.
            for i in range(ng):
                o = o + jnp.dot(ctx[i].astype(jnp.bfloat16), wo_ref[g0 + i],
                                preferred_element_type=jnp.float32)

        # ---- LayerNorm 1 (f32)
        mu = jnp.mean(o, axis=-1, keepdims=True)
        var = jnp.mean((o - mu) ** 2, axis=-1, keepdims=True)
        o = (o - mu) * jax.lax.rsqrt(var + eps)
        o = o * ln1_g_ref[...] + ln1_b_ref[...]

        # ---- Position-wise FFN (bf16 MXU operands, f32 accumulation)
        # TODO(synk): for production shapes, K-tile w1/w2 over d_inner with a VMEM f32
        # accumulator instead of keeping both FFN weights fully resident.
        h1 = jnp.dot(o.astype(jnp.bfloat16), w1_ref[...],
                     preferred_element_type=jnp.float32) + b1_ref[...]
        h1 = jnp.maximum(h1, 0.0)
        h2 = jnp.dot(h1.astype(jnp.bfloat16), w2_ref[...],
                     preferred_element_type=jnp.float32) + b2_ref[...]
        y = h2 + o                                                   # residual

        # ---- LayerNorm 2 (f32)
        mu2 = jnp.mean(y, axis=-1, keepdims=True)
        var2 = jnp.mean((y - mu2) ** 2, axis=-1, keepdims=True)
        y = (y - mu2) * jax.lax.rsqrt(var2 + eps)
        y = y * ln2_g_ref[...] + ln2_b_ref[...]

        out_ref[...] = y.astype(out_ref.dtype)

    if return_attn:
        def kernel(x_ref, bias_ref, wq_ref, wk_ref, wv_ref, wo_ref,
                   ln1_g_ref, ln1_b_ref, w1_ref, b1_ref, w2_ref, b2_ref,
                   ln2_g_ref, ln2_b_ref, out_ref, attn_ref, k_sc, v_sc):
            _compute(x_ref, bias_ref, wq_ref, wk_ref, wv_ref, wo_ref,
                     ln1_g_ref, ln1_b_ref, w1_ref, b1_ref, w2_ref, b2_ref,
                     ln2_g_ref, ln2_b_ref, out_ref, attn_ref, k_sc, v_sc)
    else:
        def kernel(x_ref, bias_ref, wq_ref, wk_ref, wv_ref, wo_ref,
                   ln1_g_ref, ln1_b_ref, w1_ref, b1_ref, w2_ref, b2_ref,
                   ln2_g_ref, ln2_b_ref, out_ref, k_sc, v_sc):
            _compute(x_ref, bias_ref, wq_ref, wk_ref, wv_ref, wo_ref,
                     ln1_g_ref, ln1_b_ref, w1_ref, b1_ref, w2_ref, b2_ref,
                     ln2_g_ref, ln2_b_ref, out_ref, None, k_sc, v_sc)
    return kernel


def _const_spec(shape, single_buffer):
    # Constant-index operands: fetched once; single-buffer them when supported so they
    # do not pay the default double-buffer VMEM cost.
    idx = lambda *args, _n=len(shape): (0,) * _n
    if single_buffer:
        return pl.BlockSpec(shape, idx, pipeline_mode=pl.Buffered(1))
    return pl.BlockSpec(shape, idx)


@functools.partial(jax.jit,
                   static_argnames=("n_head", "d_k", "d_v", "return_attn",
                                    "attn_dtype", "single_buffer_consts"))
def _encoder_layer_impl(x, mask, params, *, n_head, d_k, d_v, return_attn,
                        attn_dtype, single_buffer_consts):
    B, L, d_model = x.shape
    d_inner = params["w1"].shape[1]
    vmem_cap = _vmem_capacity_bytes()
    tq = _pick_tq(L, vmem_cap, return_attn)
    nq = L // tq

    # bf16 MXU operands; fold the 1/sqrt(d_k) attention scale into Wq; Wo head-major.
    scale = 1.0 / (d_k ** 0.5)
    wq = (params["wq"] * scale).astype(jnp.bfloat16)
    wk = params["wk"].astype(jnp.bfloat16)
    wv = params["wv"].astype(jnp.bfloat16)
    wo_heads = params["wo"].reshape(n_head, d_v, d_model).astype(jnp.bfloat16)
    w1 = params["w1"].astype(jnp.bfloat16)
    w2 = params["w2"].astype(jnp.bfloat16)
    # Additive mask bias (mask==0 -> -1e9) shipped in bf16 (halves the mask DMA and
    # removes the in-kernel compare).
    bias = jnp.where(mask == 0, jnp.float32(-1e9), jnp.float32(0.0)).astype(jnp.bfloat16)

    kernel = _make_kernel(n_head, d_k, d_v, tq, return_attn)
    sb = single_buffer_consts

    in_specs = [
        pl.BlockSpec((None, L, d_model), lambda b, qi: (b, 0, 0)),   # x (resident over qi)
        pl.BlockSpec((None, tq, L), lambda b, qi: (b, qi, 0)),       # mask bias (bf16)
        _const_spec((d_model, n_head * d_k), sb),                    # wq (pre-scaled)
        _const_spec((d_model, n_head * d_k), sb),                    # wk
        _const_spec((d_model, n_head * d_v), sb),                    # wv
        _const_spec((n_head, d_v, d_model), sb),                     # wo (head-major)
        _const_spec((1, d_model), sb),                               # ln1 gamma
        _const_spec((1, d_model), sb),                               # ln1 beta
        _const_spec((d_model, d_inner), sb),                         # w1
        _const_spec((1, d_inner), sb),                               # b1
        _const_spec((d_inner, d_model), sb),                         # w2
        _const_spec((1, d_model), sb),                               # b2
        _const_spec((1, d_model), sb),                               # ln2 gamma
        _const_spec((1, d_model), sb),                               # ln2 beta
    ]
    out_specs = [pl.BlockSpec((None, tq, d_model), lambda b, qi: (b, qi, 0))]
    out_shape = [jax.ShapeDtypeStruct((B, L, d_model), jnp.float32)]
    if return_attn:
        out_specs.append(pl.BlockSpec((None, n_head, tq, L), lambda b, qi: (b, 0, qi, 0)))
        out_shape.append(jax.ShapeDtypeStruct((B, n_head, L, L), attn_dtype))

    scratch_shapes = [
        pltpu.VMEM((n_head, L, d_k), jnp.bfloat16),     # K heads (per batch element)
        pltpu.VMEM((n_head, L, d_v), jnp.bfloat16),     # V heads (per batch element)
    ]

    # VMEM budget: pipelined I/O blocks + (single- or double-buffered) constants +
    # scratch, with margin, clamped to ~80% of the part's physical VMEM.
    wbuf = 1 if sb else 2
    const_bytes = wbuf * (
        2 * _nbytes((d_model, n_head * d_k), jnp.bfloat16)
        + _nbytes((d_model, n_head * d_v), jnp.bfloat16)
        + _nbytes((n_head, d_v, d_model), jnp.bfloat16)
        + _nbytes((d_model, d_inner), jnp.bfloat16)
        + _nbytes((d_inner, d_model), jnp.bfloat16)
        + _nbytes((1, d_inner), jnp.float32)
        + 5 * _nbytes((1, d_model), jnp.float32)
    )
    io_bytes = 2 * (
        _nbytes((L, d_model), jnp.float32)
        + _nbytes((tq, L), jnp.bfloat16)
        + _nbytes((tq, d_model), jnp.float32)
        + (_nbytes((n_head, tq, L), attn_dtype) if return_attn else 0)
    )
    scratch_bytes = (_nbytes((n_head, L, d_k), jnp.bfloat16)
                     + _nbytes((n_head, L, d_v), jnp.bfloat16))
    need = const_bytes + io_bytes + scratch_bytes
    vmem_limit = max(32 * 2 ** 20,
                     min(int(0.8 * vmem_cap), int(1.5 * need) + (8 << 20)))

    grid_spec = pltpu.PrefetchScalarGridSpec(
        num_scalar_prefetch=0,
        grid=(B, nq),
        in_specs=in_specs,
        out_specs=out_specs,
        scratch_shapes=scratch_shapes,
    )

    # NOTE(v7x): only the batch axis is marked "parallel"; with B < 2 one of the two
    # TensorCores idles -- use batch >= 2 (even) for full utilization on v7x.
    outs = pl.pallas_call(
        kernel,
        out_shape=tuple(out_shape),
        grid_spec=grid_spec,
        compiler_params=pltpu.CompilerParams(
            dimension_semantics=("parallel", "arbitrary"),   # K/V scratch reused over qi
            vmem_limit_bytes=vmem_limit,
        ),
    )(
        x, bias,
        wq, wk, wv, wo_heads,
        params["ln1_g"], params["ln1_b"],
        w1, params["b1"], w2, params["b2"],
        params["ln2_g"], params["ln2_b"],
    )
    if return_attn:
        return outs[0], outs[1]
    return outs[0], None


def encoder_layer(x, mask, params, *, n_head, d_k, d_v, return_attn=True,
                  attn_dtype=jnp.float32):
    kwargs = dict(n_head=n_head, d_k=d_k, d_v=d_v, return_attn=return_attn,
                  attn_dtype=attn_dtype)
    try:
        return _encoder_layer_impl(x, mask, params, single_buffer_consts=True, **kwargs)
    except Exception:
        # pl.Buffered(1) single-buffering of the constant operands is purely a VMEM
        # footprint optimization; fall back to default double-buffering if the installed
        # Pallas/Mosaic version does not accept it.
        return _encoder_layer_impl(x, mask, params, single_buffer_consts=False, **kwargs)


def reference(x, mask, params, n_head, d_k, d_v):
    B, L, d_model = x.shape
    q = x @ params["wq"]
    k = x @ params["wk"]
    v = x @ params["wv"]
    q = q.reshape(B, L, n_head, d_k).transpose(0, 2, 1, 3)
    k = k.reshape(B, L, n_head, d_k).transpose(0, 2, 1, 3)
    v = v.reshape(B, L, n_head, d_v).transpose(0, 2, 1, 3)
    s = jnp.einsum("bhqd,bhkd->bhqk", q / (d_k ** 0.5), k)
    s = jnp.where(mask[:, None, :, :] == 0, -1e9, s)
    p = jax.nn.softmax(s, axis=-1)
    o = jnp.einsum("bhqk,bhkd->bhqd", p, v)
    o = o.transpose(0, 2, 1, 3).reshape(B, L, n_head * d_v)
    o = o @ params["wo"] + x
    mu = o.mean(-1, keepdims=True)
    var = ((o - mu) ** 2).mean(-1, keepdims=True)
    o = (o - mu) / jnp.sqrt(var + 1e-6) * params["ln1_g"] + params["ln1_b"]
    h = jax.nn.relu(o @ params["w1"] + params["b1"]) @ params["w2"] + params["b2"]
    y = h + o
    mu2 = y.mean(-1, keepdims=True)
    var2 = ((y - mu2) ** 2).mean(-1, keepdims=True)
    y = (y - mu2) / jnp.sqrt(var2 + 1e-6) * params["ln2_g"] + params["ln2_b"]
    return y, p


if __name__ == "__main__":
    # Small deterministic config
    B, L = 2, 8
    d_model, d_inner, n_head, d_k, d_v = 32, 64, 4, 8, 8

    key = jax.random.PRNGKey(0)
    keys = jax.random.split(key, 12)

    def init(k, shape, scale=0.1):
        return jax.random.normal(k, shape, dtype=jnp.float32) * scale

    params = {
        "wq": init(keys[0], (d_model, n_head * d_k)),
        "wk": init(keys[1], (d_model, n_head * d_k)),
        "wv": init(keys[2], (d_model, n_head * d_v)),
        "wo": init(keys[3], (n_head * d_v, d_model)),
        "ln1_g": jnp.ones((1, d_model), jnp.float32),
        "ln1_b": jnp.zeros((1, d_model), jnp.float32),
        "w1": init(keys[4], (d_model, d_inner)),
        "b1": init(keys[5], (1, d_inner)),
        "w2": init(keys[6], (d_inner, d_model)),
        "b2": init(keys[7], (1, d_model)),
        "ln2_g": jnp.ones((1, d_model), jnp.float32),
        "ln2_b": jnp.zeros((1, d_model), jnp.float32),
    }

    x = jax.random.normal(keys[8], (B, L, d_model), dtype=jnp.float32)
    # all-ones mask == no masking (mask semantics: 0 => position is masked out)
    mask = jnp.ones((B, L, L), dtype=jnp.float32)

    enc_out, enc_slf_attn = encoder_layer(x, mask, params,
                                          n_head=n_head, d_k=d_k, d_v=d_v)
    enc_out = jax.block_until_ready(enc_out)
    enc_slf_attn = jax.block_until_ready(enc_slf_attn)

    ref_out, ref_attn = reference(x, mask, params, n_head, d_k, d_v)

    assert enc_out.shape == (B, L, d_model)
    assert enc_slf_attn.shape == (B, n_head, L, L)
    assert bool(jnp.isfinite(enc_out).all())
    assert np.allclose(np.asarray(enc_out), np.asarray(ref_out), atol=5e-2, rtol=5e-2)
    assert np.allclose(np.asarray(enc_slf_attn), np.asarray(ref_attn), atol=5e-2, rtol=5e-2)

    # Also exercise the no-attention fast path (unnormalized-PV, no O(L^2) writeback).
    out_fast, attn_fast = encoder_layer(x, mask, params, n_head=n_head, d_k=d_k, d_v=d_v,
                                        return_attn=False)
    out_fast = jax.block_until_ready(out_fast)
    assert attn_fast is None
    assert np.allclose(np.asarray(out_fast), np.asarray(ref_out), atol=5e-2, rtol=5e-2)

    print("KERNEL_OK")
</pallas_src>

<mosaic_0001>
module attributes {stable_mosaic.version = 11 : i64} {
  func.func @kernel(%arg0: i32, %arg1: i32, %arg2: memref<1x8x32xf32, #tpu.memory_space<vmem>>, %arg3: memref<1x8x8xbf16, #tpu.memory_space<vmem>>, %arg4: memref<32x32xbf16, #tpu.memory_space<vmem>>, %arg5: memref<32x32xbf16, #tpu.memory_space<vmem>>, %arg6: memref<32x32xbf16, #tpu.memory_space<vmem>>, %arg7: memref<4x8x32xbf16, #tpu.memory_space<vmem>>, %arg8: memref<1x32xf32, #tpu.memory_space<vmem>>, %arg9: memref<1x32xf32, #tpu.memory_space<vmem>>, %arg10: memref<32x64xbf16, #tpu.memory_space<vmem>>, %arg11: memref<1x64xf32, #tpu.memory_space<vmem>>, %arg12: memref<64x32xbf16, #tpu.memory_space<vmem>>, %arg13: memref<1x32xf32, #tpu.memory_space<vmem>>, %arg14: memref<1x32xf32, #tpu.memory_space<vmem>>, %arg15: memref<1x32xf32, #tpu.memory_space<vmem>>, %arg16: memref<1x8x32xf32, #tpu.memory_space<vmem>>, %arg17: memref<1x4x8x8xf32, #tpu.memory_space<vmem>>, %arg18: memref<4x8x8xbf16, #tpu.memory_space<vmem>>, %arg19: memref<4x8x8xbf16, #tpu.memory_space<vmem>>) attributes {dimension_semantics = [#tpu.dimension_semantics<parallel>, #tpu.dimension_semantics<arbitrary>], iteration_bounds = array<i64: 2, 1>, scalar_prefetch = 0 : i64, scratch_operands = 2 : i64, tpu.core_type = #tpu.core_type<tc>, window_params = [{transform_indices = @transform_0, window_bounds = array<i64: 1, 8, 32>}, {transform_indices = @transform_1, window_bounds = array<i64: 1, 8, 8>}, {pipeline_mode = #tpu.pipeline_mode<synchronous>, transform_indices = @transform_2, window_bounds = array<i64: 32, 32>}, {pipeline_mode = #tpu.pipeline_mode<synchronous>, transform_indices = @transform_3, window_bounds = array<i64: 32, 32>}, {pipeline_mode = #tpu.pipeline_mode<synchronous>, transform_indices = @transform_4, window_bounds = array<i64: 32, 32>}, {pipeline_mode = #tpu.pipeline_mode<synchronous>, transform_indices = @transform_5, window_bounds = array<i64: 4, 8, 32>}, {pipeline_mode = #tpu.pipeline_mode<synchronous>, transform_indices = @transform_6, window_bounds = array<i64: 1, 32>}, {pipeline_mode = #tpu.pipeline_mode<synchronous>, transform_indices = @transform_7, window_bounds = array<i64: 1, 32>}, {pipeline_mode = #tpu.pipeline_mode<synchronous>, transform_indices = @transform_8, window_bounds = array<i64: 32, 64>}, {pipeline_mode = #tpu.pipeline_mode<synchronous>, transform_indices = @transform_9, window_bounds = array<i64: 1, 64>}, {pipeline_mode = #tpu.pipeline_mode<synchronous>, transform_indices = @transform_10, window_bounds = array<i64: 64, 32>}, {pipeline_mode = #tpu.pipeline_mode<synchronous>, transform_indices = @transform_11, window_bounds = array<i64: 1, 32>}, {pipeline_mode = #tpu.pipeline_mode<synchronous>, transform_indices = @transform_12, window_bounds = array<i64: 1, 32>}, {pipeline_mode = #tpu.pipeline_mode<synchronous>, transform_indices = @transform_13, window_bounds = array<i64: 1, 32>}, {transform_indices = @transform_14, window_bounds = array<i64: 1, 8, 32>}, {transform_indices = @transform_15, window_bounds = array<i64: 1, 4, 8, 8>}]} {
    %c0_i32 = arith.constant 0 : i32
    %0 = arith.cmpi eq, %arg1, %c0_i32 : i32
    %1 = arith.extui %0 : i1 to i32
    %c0_i32_0 = arith.constant 0 : i32
    %2 = arith.cmpi ne, %1, %c0_i32_0 : i32
    scf.if %2 {
      %c0_66 = arith.constant 0 : index
      %c0_67 = arith.constant 0 : index
      %c0_68 = arith.constant 0 : index
      %139 = vector.load %arg2[%c0_66, %c0_67, %c0_68] : memref<1x8x32xf32, #tpu.memory_space<vmem>>, vector<1x8x32xf32>
      %140 = vector.shape_cast %139 : vector<1x8x32xf32> to vector<8x32xf32>
      %141 = arith.truncf %140 : vector<8x32xf32> to vector<8x32xbf16>
      %c0_69 = arith.constant 0 : index
      %c0_70 = arith.constant 0 : index
      %142 = vector.load %arg5[%c0_69, %c0_70] : memref<32x32xbf16, #tpu.memory_space<vmem>>, vector<32x32xbf16>
      %cst_71 = arith.constant dense<0.000000e+00> : vector<8x32xf32>
      %143 = tpu.matmul %141, %142, %cst_71 {dimension_numbers = #tpu.dot_dimension_numbers<[1], [0], [0], [1], [0, 0, 1, 1], [], []>} : vector<8x32xbf16>, vector<32x32xbf16>, vector<8x32xf32> -> vector<8x32xf32>
      %c0_72 = arith.constant 0 : index
      %c0_73 = arith.constant 0 : index
      %144 = vector.load %arg6[%c0_72, %c0_73] : memref<32x32xbf16, #tpu.memory_space<vmem>>, vector<32x32xbf16>
      %cst_74 = arith.constant dense<0.000000e+00> : vector<8x32xf32>
      %145 = tpu.matmul %141, %144, %cst_74 {dimension_numbers = #tpu.dot_dimension_numbers<[1], [0], [0], [1], [0, 0, 1, 1], [], []>} : vector<8x32xbf16>, vector<32x32xbf16>, vector<8x32xf32> -> vector<8x32xf32>
      %146 = vector.extract_strided_slice %143 {offsets = [0, 0], sizes = [8, 8], strides = [1, 1]} : vector<8x32xf32> to vector<8x8xf32>
      %147 = arith.truncf %146 : vector<8x8xf32> to vector<8x8xbf16>
      %c0_75 = arith.constant 0 : index
      %c0_76 = arith.constant 0 : index
      %c0_77 = arith.constant 0 : index
      %148 = vector.load %arg18[%c0_75, %c0_76, %c0_77] : memref<4x8x8xbf16, #tpu.memory_space<vmem>>, vector<1x8x8xbf16>
      %149 = vector.shape_cast %148 : vector<1x8x8xbf16> to vector<8x8xbf16>
      %150 = vector.shape_cast %147 : vector<8x8xbf16> to vector<1x8x8xbf16>
      tpu.vector_store %arg18[%c0_75, %c0_76, %c0_77], %150 {strides = array<i32>} : memref<4x8x8xbf16, #tpu.memory_space<vmem>>, vector<1x8x8xbf16>,
      %151 = vector.extract_strided_slice %145 {offsets = [0, 0], sizes = [8, 8], strides = [1, 1]} : vector<8x32xf32> to vector<8x8xf32>
      %152 = arith.truncf %151 : vector<8x8xf32> to vector<8x8xbf16>
      %c0_78 = arith.constant 0 : index
      %c0_79 = arith.constant 0 : index
      %c0_80 = arith.constant 0 : index
      %153 = vector.load %arg19[%c0_78, %c0_79, %c0_80] : memref<4x8x8xbf16, #tpu.memory_space<vmem>>, vector<1x8x8xbf16>
      %154 = vector.shape_cast %153 : vector<1x8x8xbf16> to vector<8x8xbf16>
      %155 = vector.shape_cast %152 : vector<8x8xbf16> to vector<1x8x8xbf16>
      tpu.vector_store %arg19[%c0_78, %c0_79, %c0_80], %155 {strides = array<i32>} : memref<4x8x8xbf16, #tpu.memory_space<vmem>>, vector<1x8x8xbf16>,
      %156 = vector.extract_strided_slice %143 {offsets = [0, 8], sizes = [8, 8], strides = [1, 1]} : vector<8x32xf32> to vector<8x8xf32>
      %157 = arith.truncf %156 : vector<8x8xf32> to vector<8x8xbf16>
      %c1_81 = arith.constant 1 : index
      %c0_82 = arith.constant 0 : index
      %c0_83 = arith.constant 0 : index
      %158 = vector.load %arg18[%c1_81, %c0_82, %c0_83] : memref<4x8x8xbf16, #tpu.memory_space<vmem>>, vector<1x8x8xbf16>
      %159 = vector.shape_cast %158 : vector<1x8x8xbf16> to vector<8x8xbf16>
      %160 = vector.shape_cast %157 : vector<8x8xbf16> to vector<1x8x8xbf16>
      tpu.vector_store %arg18[%c1_81, %c0_82, %c0_83], %160 {strides = array<i32>} : memref<4x8x8xbf16, #tpu.memory_space<vmem>>, vector<1x8x8xbf16>,
      %161 = vector.extract_strided_slice %145 {offsets = [0, 8], sizes = [8, 8], strides = [1, 1]} : vector<8x32xf32> to vector<8x8xf32>
      %162 = arith.truncf %161 : vector<8x8xf32> to vector<8x8xbf16>
      %c1_84 = arith.constant 1 : index
      %c0_85 = arith.constant 0 : index
      %c0_86 = arith.constant 0 : index
      %163 = vector.load %arg19[%c1_84, %c0_85, %c0_86] : memref<4x8x8xbf16, #tpu.memory_space<vmem>>, vector<1x8x8xbf16>
      %164 = vector.shape_cast %163 : vector<1x8x8xbf16> to vector<8x8xbf16>
      %165 = vector.shape_cast %162 : vector<8x8xbf16> to vector<1x8x8xbf16>
      tpu.vector_store %arg19[%c1_84, %c0_85, %c0_86], %165 {strides = array<i32>} : memref<4x8x8xbf16, #tpu.memory_space<vmem>>, vector<1x8x8xbf16>,
      %166 = vector.extract_strided_slice %143 {offsets = [0, 16], sizes = [8, 8], strides = [1, 1]} : vector<8x32xf32> to vector<8x8xf32>
      %167 = arith.truncf %166 : vector<8x8xf32> to vector<8x8xbf16>
      %c2_87 = arith.constant 2 : index
      %c0_88 = arith.constant 0 : index
      %c0_89 = arith.constant 0 : index
      %168 = vector.load %arg18[%c2_87, %c0_88, %c0_89] : memref<4x8x8xbf16, #tpu.memory_space<vmem>>, vector<1x8x8xbf16>
      %169 = vector.shape_cast %168 : vector<1x8x8xbf16> to vector<8x8xbf16>
      %170 = vector.shape_cast %167 : vector<8x8xbf16> to vector<1x8x8xbf16>
      tpu.vector_store %arg18[%c2_87, %c0_88, %c0_89], %170 {strides = array<i32>} : memref<4x8x8xbf16, #tpu.memory_space<vmem>>, vector<1x8x8xbf16>,
      %171 = vector.extract_strided_slice %145 {offsets = [0, 16], sizes = [8, 8], strides = [1, 1]} : vector<8x32xf32> to vector<8x8xf32>
      %172 = arith.truncf %171 : vector<8x8xf32> to vector<8x8xbf16>
      %c2_90 = arith.constant 2 : index
      %c0_91 = arith.constant 0 : index
      %c0_92 = arith.constant 0 : index
      %173 = vector.load %arg19[%c2_90, %c0_91, %c0_92] : memref<4x8x8xbf16, #tpu.memory_space<vmem>>, vector<1x8x8xbf16>
      %174 = vector.shape_cast %173 : vector<1x8x8xbf16> to vector<8x8xbf16>
      %175 = vector.shape_cast %172 : vector<8x8xbf16> to vector<1x8x8xbf16>
      tpu.vector_store %arg19[%c2_90, %c0_91, %c0_92], %175 {strides = array<i32>} : memref<4x8x8xbf16, #tpu.memory_space<vmem>>, vector<1x8x8xbf16>,
      %176 = vector.extract_strided_slice %143 {offsets = [0, 24], sizes = [8, 8], strides = [1, 1]} : vector<8x32xf32> to vector<8x8xf32>
      %177 = arith.truncf %176 : vector<8x8xf32> to vector<8x8xbf16>
      %c3_93 = arith.constant 3 : index
      %c0_94 = arith.constant 0 : index
      %c0_95 = arith.constant 0 : index
      %178 = vector.load %arg18[%c3_93, %c0_94, %c0_95] : memref<4x8x8xbf16, #tpu.memory_space<vmem>>, vector<1x8x8xbf16>
      %179 = vector.shape_cast %178 : vector<1x8x8xbf16> to vector<8x8xbf16>
      %180 = vector.shape_cast %177 : vector<8x8xbf16> to vector<1x8x8xbf16>
      tpu.vector_store %arg18[%c3_93, %c0_94, %c0_95], %180 {strides = array<i32>} : memref<4x8x8xbf16, #tpu.memory_space<vmem>>, vector<1x8x8xbf16>,
      %181 = vector.extract_strided_slice %145 {offsets = [0, 24], sizes = [8, 8], strides = [1, 1]} : vector<8x32xf32> to vector<8x8xf32>
      %182 = arith.truncf %181 : vector<8x8xf32> to vector<8x8xbf16>
      %c3_96 = arith.constant 3 : index
      %c0_97 = arith.constant 0 : index
      %c0_98 = arith.constant 0 : index
      %183 = vector.load %arg19[%c3_96, %c0_97, %c0_98] : memref<4x8x8xbf16, #tpu.memory_space<vmem>>, vector<1x8x8xbf16>
      %184 = vector.shape_cast %183 : vector<1x8x8xbf16> to vector<8x8xbf16>
      %185 = vector.shape_cast %182 : vector<8x8xbf16> to vector<1x8x8xbf16>
      tpu.vector_store %arg19[%c3_96, %c0_97, %c0_98], %185 {strides = array<i32>} : memref<4x8x8xbf16, #tpu.memory_space<vmem>>, vector<1x8x8xbf16>,
    } else {
    }
    %c8_i32 = arith.constant 8 : i32
    %3 = arith.muli %arg1, %c8_i32 : i32
    %4 = tpu.assume_multiple %3, 8 : i32
    %c0 = arith.constant 0 : index
    %5 = arith.index_cast %4 : i32 to index
    %c0_1 = arith.constant 0 : index
    %6 = vector.load %arg2[%c0, %5, %c0_1] : memref<1x8x32xf32, #tpu.memory_space<vmem>>, vector<1x8x32xf32>
    %7 = vector.shape_cast %6 : vector<1x8x32xf32> to vector<8x32xf32>
    %8 = arith.truncf %7 : vector<8x32xf32> to vector<8x32xbf16>
    %c0_2 = arith.constant 0 : index
    %c0_3 = arith.constant 0 : index
    %9 = vector.load %arg4[%c0_2, %c0_3] : memref<32x32xbf16, #tpu.memory_space<vmem>>, vector<32x32xbf16>
    %cst = arith.constant dense<0.000000e+00> : vector<8x32xf32>
    %10 = tpu.matmul %8, %9, %cst {dimension_numbers = #tpu.dot_dimension_numbers<[1], [0], [0], [1], [0, 0, 1, 1], [], []>} : vector<8x32xbf16>, vector<32x32xbf16>, vector<8x32xf32> -> vector<8x32xf32>
    %c0_4 = arith.constant 0 : index
    %c0_5 = arith.constant 0 : index
    %c0_6 = arith.constant 0 : index
    %11 = vector.load %arg3[%c0_4, %c0_5, %c0_6] : memref<1x8x8xbf16, #tpu.memory_space<vmem>>, vector<1x8x8xbf16>
    %12 = vector.shape_cast %11 : vector<1x8x8xbf16> to vector<8x8xbf16>
    %13 = arith.extf %12 : vector<8x8xbf16> to vector<8x8xf32>
    %14 = vector.shape_cast %13 : vector<8x8xf32> to vector<1x8x8xf32>
    %15 = vector.extract_strided_slice %10 {offsets = [0, 0], sizes = [8, 8], strides = [1, 1]} : vector<8x32xf32> to vector<8x8xf32>
    %16 = vector.extract_strided_slice %10 {offsets = [0, 8], sizes = [8, 8], strides = [1, 1]} : vector<8x32xf32> to vector<8x8xf32>
    %17 = vector.extract_strided_slice %10 {offsets = [0, 16], sizes = [8, 8], strides = [1, 1]} : vector<8x32xf32> to vector<8x8xf32>
    %18 = vector.extract_strided_slice %10 {offsets = [0, 24], sizes = [8, 8], strides = [1, 1]} : vector<8x32xf32> to vector<8x8xf32>
    %19 = vector.shape_cast %15 : vector<8x8xf32> to vector<1x8x8xf32>
    %20 = vector.shape_cast %16 : vector<8x8xf32> to vector<1x8x8xf32>
    %21 = vector.shape_cast %17 : vector<8x8xf32> to vector<1x8x8xf32>
    %22 = vector.shape_cast %18 : vector<8x8xf32> to vector<1x8x8xf32>
    %23 = tpu.concatenate %19, %20, %21, %22 in 0 : vector<1x8x8xf32>, vector<1x8x8xf32>, vector<1x8x8xf32>, vector<1x8x8xf32> -> vector<4x8x8xf32>
    %24 = arith.truncf %23 : vector<4x8x8xf32> to vector<4x8x8xbf16>
    %c0_7 = arith.constant 0 : index
    %c0_8 = arith.constant 0 : index
    %c0_9 = arith.constant 0 : index
    %25 = vector.load %arg18[%c0_7, %c0_8, %c0_9] : memref<4x8x8xbf16, #tpu.memory_space<vmem>>, vector<4x8x8xbf16>
    %c0_10 = arith.constant 0 : index
    %c0_11 = arith.constant 0 : index
    %c0_12 = arith.constant 0 : index
    %26 = vector.load %arg19[%c0_10, %c0_11, %c0_12] : memref<4x8x8xbf16, #tpu.memory_space<vmem>>, vector<4x8x8xbf16>
    "tpu.trace_start"() <{level = 10 : i32, message = "hqd,hkd->hqk"}> : () -> ()
    %cst_13 = arith.constant dense<0.000000e+00> : vector<4x8x8xf32>
    %27 = tpu.matmul %24, %25, %cst_13 {dimension_numbers = #tpu.dot_dimension_numbers<[2], [2], [1], [1], [0, 0, 0, 1, 1, 1], [0], [0]>} : vector<4x8x8xbf16>, vector<4x8x8xbf16>, vector<4x8x8xf32> -> vector<4x8x8xf32>
    "tpu.trace_stop"() : () -> ()
    %28 = vector.broadcast %14 : vector<1x8x8xf32> to vector<4x8x8xf32>
    %29 = arith.addf %27, %28 : vector<4x8x8xf32>
    %cst_14 = arith.constant dense<0xFF800000> : vector<4x8xf32>
    %30 = vector.multi_reduction <maximumf>, %29, %cst_14 [2] : vector<4x8x8xf32> to vector<4x8xf32>
    %31 = vector.shape_cast %30 : vector<4x8xf32> to vector<4x8x1xf32>
    %32 = vector.broadcast %31 : vector<4x8x1xf32> to vector<4x8x8xf32>
    %33 = arith.subf %29, %32 : vector<4x8x8xf32>
    %34 = math.exp %33 : vector<4x8x8xf32>
    %cst_15 = arith.constant dense<0.000000e+00> : vector<4x8xf32>
    %35 = vector.multi_reduction <add>, %34, %cst_15 [2] : vector<4x8x8xf32> to vector<4x8xf32>
    %36 = vector.shape_cast %35 : vector<4x8xf32> to vector<4x8x1xf32>
    %37 = tpu.reciprocal %36 {approx = true} : vector<4x8x1xf32> -> vector<4x8x1xf32>
    %38 = vector.broadcast %37 : vector<4x8x1xf32> to vector<4x8x8xf32>
    %39 = arith.mulf %34, %38 : vector<4x8x8xf32>
    %c0_16 = arith.constant 0 : index
    %c0_17 = arith.constant 0 : index
    %c0_18 = arith.constant 0 : index
    %c0_19 = arith.constant 0 : index
    %40 = vector.load %arg17[%c0_16, %c0_17, %c0_18, %c0_19] : memref<1x4x8x8xf32, #tpu.memory_space<vmem>>, vector<1x4x8x8xf32>
    %41 = vector.shape_cast %40 : vector<1x4x8x8xf32> to vector<4x8x8xf32>
    %42 = vector.shape_cast %39 : vector<4x8x8xf32> to vector<1x4x8x8xf32>
    tpu.vector_store %arg17[%c0_16, %c0_17, %c0_18, %c0_19], %42 {strides = array<i32>} : memref<1x4x8x8xf32, #tpu.memory_space<vmem>>, vector<1x4x8x8xf32>,
    %43 = arith.truncf %39 : vector<4x8x8xf32> to vector<4x8x8xbf16>
    "tpu.trace_start"() <{level = 10 : i32, message = "hqk,hkd->hqd"}> : () -> ()
    %cst_20 = arith.constant dense<0.000000e+00> : vector<4x8x8xf32>
    %44 = tpu.matmul %43, %26, %cst_20 {dimension_numbers = #tpu.dot_dimension_numbers<[2], [1], [1], [2], [0, 0, 0, 1, 1, 2], [0], [0]>} : vector<4x8x8xbf16>, vector<4x8x8xbf16>, vector<4x8x8xf32> -> vector<4x8x8xf32>
    "tpu.trace_stop"() : () -> ()
    %45 = vector.extract_strided_slice %44 {offsets = [0, 0, 0], sizes = [1, 8, 8], strides = [1, 1, 1]} : vector<4x8x8xf32> to vector<1x8x8xf32>
    %46 = vector.shape_cast %45 : vector<1x8x8xf32> to vector<8x8xf32>
    %47 = arith.truncf %46 : vector<8x8xf32> to vector<8x8xbf16>
    %c0_21 = arith.constant 0 : index
    %c0_22 = arith.constant 0 : index
    %c0_23 = arith.constant 0 : index
    %48 = vector.load %arg7[%c0_21, %c0_22, %c0_23] : memref<4x8x32xbf16, #tpu.memory_space<vmem>>, vector<1x8x32xbf16>
    %49 = vector.shape_cast %48 : vector<1x8x32xbf16> to vector<8x32xbf16>
    %cst_24 = arith.constant dense<0.000000e+00> : vector<8x32xf32>
    %50 = tpu.matmul %47, %49, %cst_24 {dimension_numbers = #tpu.dot_dimension_numbers<[1], [0], [0], [1], [0, 0, 1, 1], [], []>} : vector<8x8xbf16>, vector<8x32xbf16>, vector<8x32xf32> -> vector<8x32xf32>
    %51 = arith.addf %7, %50 : vector<8x32xf32>
    %52 = vector.extract_strided_slice %44 {offsets = [1, 0, 0], sizes = [1, 8, 8], strides = [1, 1, 1]} : vector<4x8x8xf32> to vector<1x8x8xf32>
    %53 = vector.shape_cast %52 : vector<1x8x8xf32> to vector<8x8xf32>
    %54 = arith.truncf %53 : vector<8x8xf32> to vector<8x8xbf16>
    %c1 = arith.constant 1 : index
    %c0_25 = arith.constant 0 : index
    %c0_26 = arith.constant 0 : index
    %55 = vector.load %arg7[%c1, %c0_25, %c0_26] : memref<4x8x32xbf16, #tpu.memory_space<vmem>>, vector<1x8x32xbf16>
    %56 = vector.shape_cast %55 : vector<1x8x32xbf16> to vector<8x32xbf16>
    %cst_27 = arith.constant dense<0.000000e+00> : vector<8x32xf32>
    %57 = tpu.matmul %54, %56, %cst_27 {dimension_numbers = #tpu.dot_dimension_numbers<[1], [0], [0], [1], [0, 0, 1, 1], [], []>} : vector<8x8xbf16>, vector<8x32xbf16>, vector<8x32xf32> -> vector<8x32xf32>
    %58 = arith.addf %51, %57 : vector<8x32xf32>
    %59 = vector.extract_strided_slice %44 {offsets = [2, 0, 0], sizes = [1, 8, 8], strides = [1, 1, 1]} : vector<4x8x8xf32> to vector<1x8x8xf32>
    %60 = vector.shape_cast %59 : vector<1x8x8xf32> to vector<8x8xf32>
    %61 = arith.truncf %60 : vector<8x8xf32> to vector<8x8xbf16>
    %c2 = arith.constant 2 : index
    %c0_28 = arith.constant 0 : index
    %c0_29 = arith.constant 0 : index
    %62 = vector.load %arg7[%c2, %c0_28, %c0_29] : memref<4x8x32xbf16, #tpu.memory_space<vmem>>, vector<1x8x32xbf16>
    %63 = vector.shape_cast %62 : vector<1x8x32xbf16> to vector<8x32xbf16>
    %cst_30 = arith.constant dense<0.000000e+00> : vector<8x32xf32>
    %64 = tpu.matmul %61, %63, %cst_30 {dimension_numbers = #tpu.dot_dimension_numbers<[1], [0], [0], [1], [0, 0, 1, 1], [], []>} : vector<8x8xbf16>, vector<8x32xbf16>, vector<8x32xf32> -> vector<8x32xf32>
    %65 = arith.addf %58, %64 : vector<8x32xf32>
    %66 = vector.extract_strided_slice %44 {offsets = [3, 0, 0], sizes = [1, 8, 8], strides = [1, 1, 1]} : vector<4x8x8xf32> to vector<1x8x8xf32>
    %67 = vector.shape_cast %66 : vector<1x8x8xf32> to vector<8x8xf32>
    %68 = arith.truncf %67 : vector<8x8xf32> to vector<8x8xbf16>
    %c3 = arith.constant 3 : index
    %c0_31 = arith.constant 0 : index
    %c0_32 = arith.constant 0 : index
    %69 = vector.load %arg7[%c3, %c0_31, %c0_32] : memref<4x8x32xbf16, #tpu.memory_space<vmem>>, vector<1x8x32xbf16>
    %70 = vector.shape_cast %69 : vector<1x8x32xbf16> to vector<8x32xbf16>
    %cst_33 = arith.constant dense<0.000000e+00> : vector<8x32xf32>
    %71 = tpu.matmul %68, %70, %cst_33 {dimension_numbers = #tpu.dot_dimension_numbers<[1], [0], [0], [1], [0, 0, 1, 1], [], []>} : vector<8x8xbf16>, vector<8x32xbf16>, vector<8x32xf32> -> vector<8x32xf32>
    %72 = arith.addf %65, %71 : vector<8x32xf32>
    %cst_34 = arith.constant dense<0.000000e+00> : vector<8xf32>
    %73 = vector.multi_reduction <add>, %72, %cst_34 [1] : vector<8x32xf32> to vector<8xf32>
    %74 = vector.shape_cast %73 : vector<8xf32> to vector<8x1xf32>
    %cst_35 = arith.constant 3.200000e+01 : f32
    %75 = vector.broadcast %cst_35 : f32 to vector<8x1xf32>
    %76 = arith.divf %74, %75 : vector<8x1xf32>
    %77 = vector.broadcast %76 : vector<8x1xf32> to vector<8x32xf32>
    %78 = arith.subf %72, %77 : vector<8x32xf32>
    %79 = arith.mulf %78, %78 : vector<8x32xf32>
    %cst_36 = arith.constant dense<0.000000e+00> : vector<8xf32>
    %80 = vector.multi_reduction <add>, %79, %cst_36 [1] : vector<8x32xf32> to vector<8xf32>
    %81 = vector.shape_cast %80 : vector<8xf32> to vector<8x1xf32>
    %cst_37 = arith.constant 3.200000e+01 : f32
    %82 = vector.broadcast %cst_37 : f32 to vector<8x1xf32>
    %83 = arith.divf %81, %82 : vector<8x1xf32>
    %84 = vector.broadcast %76 : vector<8x1xf32> to vector<8x32xf32>
    %85 = arith.subf %72, %84 : vector<8x32xf32>
    %cst_38 = arith.constant 9.99999997E-7 : f32
    %86 = vector.broadcast %cst_38 : f32 to vector<8x1xf32>
    %87 = arith.addf %83, %86 : vector<8x1xf32>
    %88 = math.rsqrt %87 : vector<8x1xf32>
    %89 = vector.broadcast %88 : vector<8x1xf32> to vector<8x32xf32>
    %90 = arith.mulf %85, %89 : vector<8x32xf32>
    %c0_39 = arith.constant 0 : index
    %c0_40 = arith.constant 0 : index
    %91 = vector.load %arg8[%c0_39, %c0_40] : memref<1x32xf32, #tpu.memory_space<vmem>>, vector<1x32xf32>
    %92 = vector.broadcast %91 : vector<1x32xf32> to vector<8x32xf32>
    %93 = arith.mulf %90, %92 : vector<8x32xf32>
    %c0_41 = arith.constant 0 : index
    %c0_42 = arith.constant 0 : index
    %94 = vector.load %arg9[%c0_41, %c0_42] : memref<1x32xf32, #tpu.memory_space<vmem>>, vector<1x32xf32>
    %95 = vector.broadcast %94 : vector<1x32xf32> to vector<8x32xf32>
    %96 = arith.addf %93, %95 : vector<8x32xf32>
    %97 = arith.truncf %96 : vector<8x32xf32> to vector<8x32xbf16>
    %c0_43 = arith.constant 0 : index
    %c0_44 = arith.constant 0 : index
    %98 = vector.load %arg10[%c0_43, %c0_44] : memref<32x64xbf16, #tpu.memory_space<vmem>>, vector<32x64xbf16>
    %cst_45 = arith.constant dense<0.000000e+00> : vector<8x64xf32>
    %99 = tpu.matmul %97, %98, %cst_45 {dimension_numbers = #tpu.dot_dimension_numbers<[1], [0], [0], [1], [0, 0, 1, 1], [], []>} : vector<8x32xbf16>, vector<32x64xbf16>, vector<8x64xf32> -> vector<8x64xf32>
    %c0_46 = arith.constant 0 : index
    %c0_47 = arith.constant 0 : index
    %100 = vector.load %arg11[%c0_46, %c0_47] : memref<1x64xf32, #tpu.memory_space<vmem>>, vector<1x64xf32>
    %101 = vector.broadcast %100 : vector<1x64xf32> to vector<8x64xf32>
    %102 = arith.addf %99, %101 : vector<8x64xf32>
    %cst_48 = arith.constant 0.000000e+00 : f32
    %103 = vector.broadcast %cst_48 : f32 to vector<8x64xf32>
    %104 = arith.maximumf %102, %103 : vector<8x64xf32>
    %105 = arith.truncf %104 : vector<8x64xf32> to vector<8x64xbf16>
    %c0_49 = arith.constant 0 : index
    %c0_50 = arith.constant 0 : index
    %106 = vector.load %arg12[%c0_49, %c0_50] : memref<64x32xbf16, #tpu.memory_space<vmem>>, vector<64x32xbf16>
    %cst_51 = arith.constant dense<0.000000e+00> : vector<8x32xf32>
    %107 = tpu.matmul %105, %106, %cst_51 {dimension_numbers = #tpu.dot_dimension_numbers<[1], [0], [0], [1], [0, 0, 1, 1], [], []>} : vector<8x64xbf16>, vector<64x32xbf16>, vector<8x32xf32> -> vector<8x32xf32>
    %c0_52 = arith.constant 0 : index
    %c0_53 = arith.constant 0 : index
    %108 = vector.load %arg13[%c0_52, %c0_53] : memref<1x32xf32, #tpu.memory_space<vmem>>, vector<1x32xf32>
    %109 = vector.broadcast %108 : vector<1x32xf32> to vector<8x32xf32>
    %110 = arith.addf %107, %109 : vector<8x32xf32>
    %111 = arith.addf %110, %96 : vector<8x32xf32>
    %cst_54 = arith.constant dense<0.000000e+00> : vector<8xf32>
    %112 = vector.multi_reduction <add>, %111, %cst_54 [1] : vector<8x32xf32> to vector<8xf32>
    %113 = vector.shape_cast %112 : vector<8xf32> to vector<8x1xf32>
    %cst_55 = arith.constant 3.200000e+01 : f32
    %114 = vector.broadcast %cst_55 : f32 to vector<8x1xf32>
    %115 = arith.divf %113, %114 : vector<8x1xf32>
    %116 = vector.broadcast %115 : vector<8x1xf32> to vector<8x32xf32>
    %117 = arith.subf %111, %116 : vector<8x32xf32>
    %118 = arith.mulf %117, %117 : vector<8x32xf32>
    %cst_56 = arith.constant dense<0.000000e+00> : vector<8xf32>
    %119 = vector.multi_reduction <add>, %118, %cst_56 [1] : vector<8x32xf32> to vector<8xf32>
    %120 = vector.shape_cast %119 : vector<8xf32> to vector<8x1xf32>
    %cst_57 = arith.constant 3.200000e+01 : f32
    %121 = vector.broadcast %cst_57 : f32 to vector<8x1xf32>
    %122 = arith.divf %120, %121 : vector<8x1xf32>
    %123 = vector.broadcast %115 : vector<8x1xf32> to vector<8x32xf32>
    %124 = arith.subf %111, %123 : vector<8x32xf32>
    %cst_58 = arith.constant 9.99999997E-7 : f32
    %125 = vector.broadcast %cst_58 : f32 to vector<8x1xf32>
    %126 = arith.addf %122, %125 : vector<8x1xf32>
    %127 = math.rsqrt %126 : vector<8x1xf32>
    %128 = vector.broadcast %127 : vector<8x1xf32> to vector<8x32xf32>
    %129 = arith.mulf %124, %128 : vector<8x32xf32>
    %c0_59 = arith.constant 0 : index
    %c0_60 = arith.constant 0 : index
    %130 = vector.load %arg14[%c0_59, %c0_60] : memref<1x32xf32, #tpu.memory_space<vmem>>, vector<1x32xf32>
    %131 = vector.broadcast %130 : vector<1x32xf32> to vector<8x32xf32>
    %132 = arith.mulf %129, %131 : vector<8x32xf32>
    %c0_61 = arith.constant 0 : index
    %c0_62 = arith.constant 0 : index
    %133 = vector.load %arg15[%c0_61, %c0_62] : memref<1x32xf32, #tpu.memory_space<vmem>>, vector<1x32xf32>
    %134 = vector.broadcast %133 : vector<1x32xf32> to vector<8x32xf32>
    %135 = arith.addf %132, %134 : vector<8x32xf32>
    %c0_63 = arith.constant 0 : index
    %c0_64 = arith.constant 0 : index
    %c0_65 = arith.constant 0 : index
    %136 = vector.load %arg16[%c0_63, %c0_64, %c0_65] : memref<1x8x32xf32, #tpu.memory_space<vmem>>, vector<1x8x32xf32>
    %137 = vector.shape_cast %136 : vector<1x8x32xf32> to vector<8x32xf32>
    %138 = vector.shape_cast %135 : vector<8x32xf32> to vector<1x8x32xf32>
    tpu.vector_store %arg16[%c0_63, %c0_64, %c0_65], %138 {strides = array<i32>} : memref<1x8x32xf32, #tpu.memory_space<vmem>>, vector<1x8x32xf32>,
    return
  }
  func.func @transform_0(%arg0: i32, %arg1: i32) -> (i32, i32, i32) {
    %c0_i32 = arith.constant 0 : i32
    %c0_i32_0 = arith.constant 0 : i32
    %c0_i32_1 = arith.constant 0 : i32
    return %arg0, %c0_i32, %c0_i32_0 : i32, i32, i32
  }
  func.func @transform_1(%arg0: i32, %arg1: i32) -> (i32, i32, i32) {
    %c0_i32 = arith.constant 0 : i32
    %c0_i32_0 = arith.constant 0 : i32
    return %arg0, %arg1, %c0_i32 : i32, i32, i32
  }
  func.func @transform_2(%arg0: i32, %arg1: i32) -> (i32, i32) {
    %c0_i32 = arith.constant 0 : i32
    %c0_i32_0 = arith.constant 0 : i32
    %c0_i32_1 = arith.constant 0 : i32
    return %c0_i32, %c0_i32_0 : i32, i32
  }
  func.func @transform_3(%arg0: i32, %arg1: i32) -> (i32, i32) {
    %c0_i32 = arith.constant 0 : i32
    %c0_i32_0 = arith.constant 0 : i32
    %c0_i32_1 = arith.constant 0 : i32
    return %c0_i32, %c0_i32_0 : i32, i32
  }
  func.func @transform_4(%arg0: i32, %arg1: i32) -> (i32, i32) {
    %c0_i32 = arith.constant 0 : i32
    %c0_i32_0 = arith.constant 0 : i32
    %c0_i32_1 = arith.constant 0 : i32
    return %c0_i32, %c0_i32_0 : i32, i32
  }
  func.func @transform_5(%arg0: i32, %arg1: i32) -> (i32, i32, i32) {
    %c0_i32 = arith.constant 0 : i32
    %c0_i32_0 = arith.constant 0 : i32
    %c0_i32_1 = arith.constant 0 : i32
    %c0_i32_2 = arith.constant 0 : i32
    return %c0_i32, %c0_i32_0, %c0_i32_1 : i32, i32, i32
  }
  func.func @transform_6(%arg0: i32, %arg1: i32) -> (i32, i32) {
    %c0_i32 = arith.constant 0 : i32
    %c0_i32_0 = arith.constant 0 : i32
    %c0_i32_1 = arith.constant 0 : i32
    return %c0_i32, %c0_i32_0 : i32, i32
  }
  func.func @transform_7(%arg0: i32, %arg1: i32) -> (i32, i32) {
    %c0_i32 = arith.constant 0 : i32
    %c0_i32_0 = arith.constant 0 : i32
    %c0_i32_1 = arith.constant 0 : i32
    return %c0_i32, %c0_i32_0 : i32, i32
  }
  func.func @transform_8(%arg0: i32, %arg1: i32) -> (i32, i32) {
    %c0_i32 = arith.constant 0 : i32
    %c0_i32_0 = arith.constant 0 : i32
    %c0_i32_1 = arith.constant 0 : i32
    return %c0_i32, %c0_i32_0 : i32, i32
  }
  func.func @transform_9(%arg0: i32, %arg1: i32) -> (i32, i32) {
    %c0_i32 = arith.constant 0 : i32
    %c0_i32_0 = arith.constant 0 : i32
    %c0_i32_1 = arith.constant 0 : i32
    return %c0_i32, %c0_i32_0 : i32, i32
  }
  func.func @transform_10(%arg0: i32, %arg1: i32) -> (i32, i32) {
    %c0_i32 = arith.constant 0 : i32
    %c0_i32_0 = arith.constant 0 : i32
    %c0_i32_1 = arith.constant 0 : i32
    return %c0_i32, %c0_i32_0 : i32, i32
  }
  func.func @transform_11(%arg0: i32, %arg1: i32) -> (i32, i32) {
    %c0_i32 = arith.constant 0 : i32
    %c0_i32_0 = arith.constant 0 : i32
    %c0_i32_1 = arith.constant 0 : i32
    return %c0_i32, %c0_i32_0 : i32, i32
  }
  func.func @transform_12(%arg0: i32, %arg1: i32) -> (i32, i32) {
    %c0_i32 = arith.constant 0 : i32
    %c0_i32_0 = arith.constant 0 : i32
    %c0_i32_1 = arith.constant 0 : i32
    return %c0_i32, %c0_i32_0 : i32, i32
  }
  func.func @transform_13(%arg0: i32, %arg1: i32) -> (i32, i32) {
    %c0_i32 = arith.constant 0 : i32
    %c0_i32_0 = arith.constant 0 : i32
    %c0_i32_1 = arith.constant 0 : i32
    return %c0_i32, %c0_i32_0 : i32, i32
  }
  func.func @transform_14(%arg0: i32, %arg1: i32) -> (i32, i32, i32) {
    %c0_i32 = arith.constant 0 : i32
    %c0_i32_0 = arith.constant 0 : i32
    return %arg0, %arg1, %c0_i32 : i32, i32, i32
  }
  func.func @transform_15(%arg0: i32, %arg1: i32) -> (i32, i32, i32, i32) {
    %c0_i32 = arith.constant 0 : i32
    %c0_i32_0 = arith.constant 0 : i32
    %c0_i32_1 = arith.constant 0 : i32
    return %arg0, %c0_i32, %arg1, %c0_i32_0 : i32, i32, i32, i32
  }
}

module attributes {stable_mosaic.version = 11 : i64} {
  func.func @kernel(%arg0: i32, %arg1: i32, %arg2: memref<1x8x32xf32, #tpu.memory_space<vmem>>, %arg3: memref<1x8x8xbf16, #tpu.memory_space<vmem>>, %arg4: memref<32x32xbf16, #tpu.memory_space<vmem>>, %arg5: memref<32x32xbf16, #tpu.memory_space<vmem>>, %arg6: memref<32x32xbf16, #tpu.memory_space<vmem>>, %arg7: memref<4x8x32xbf16, #tpu.memory_space<vmem>>, %arg8: memref<1x32xf32, #tpu.memory_space<vmem>>, %arg9: memref<1x32xf32, #tpu.memory_space<vmem>>, %arg10: memref<32x64xbf16, #tpu.memory_space<vmem>>, %arg11: memref<1x64xf32, #tpu.memory_space<vmem>>, %arg12: memref<64x32xbf16, #tpu.memory_space<vmem>>, %arg13: memref<1x32xf32, #tpu.memory_space<vmem>>, %arg14: memref<1x32xf32, #tpu.memory_space<vmem>>, %arg15: memref<1x32xf32, #tpu.memory_space<vmem>>, %arg16: memref<1x8x32xf32, #tpu.memory_space<vmem>>, %arg17: memref<1x4x8x8xf32, #tpu.memory_space<vmem>>, %arg18: memref<4x8x8xbf16, #tpu.memory_space<vmem>>, %arg19: memref<4x8x8xbf16, #tpu.memory_space<vmem>>) attributes {dimension_semantics = [#tpu.dimension_semantics<parallel>, #tpu.dimension_semantics<arbitrary>], iteration_bounds = array<i64: 2, 1>, scalar_prefetch = 0 : i64, scratch_operands = 2 : i64, tpu.core_type = #tpu.core_type<tc>, window_params = [{transform_indices = @transform_0, window_bounds = array<i64: 1, 8, 32>}, {transform_indices = @transform_1, window_bounds = array<i64: 1, 8, 8>}, {pipeline_mode = #tpu.pipeline_mode<synchronous>, transform_indices = @transform_2, window_bounds = array<i64: 32, 32>}, {pipeline_mode = #tpu.pipeline_mode<synchronous>, transform_indices = @transform_3, window_bounds = array<i64: 32, 32>}, {pipeline_mode = #tpu.pipeline_mode<synchronous>, transform_indices = @transform_4, window_bounds = array<i64: 32, 32>}, {pipeline_mode = #tpu.pipeline_mode<synchronous>, transform_indices = @transform_5, window_bounds = array<i64: 4, 8, 32>}, {pipeline_mode = #tpu.pipeline_mode<synchronous>, transform_indices = @transform_6, window_bounds = array<i64: 1, 32>}, {pipeline_mode = #tpu.pipeline_mode<synchronous>, transform_indices = @transform_7, window_bounds = array<i64: 1, 32>}, {pipeline_mode = #tpu.pipeline_mode<synchronous>, transform_indices = @transform_8, window_bounds = array<i64: 32, 64>}, {pipeline_mode = #tpu.pipeline_mode<synchronous>, transform_indices = @transform_9, window_bounds = array<i64: 1, 64>}, {pipeline_mode = #tpu.pipeline_mode<synchronous>, transform_indices = @transform_10, window_bounds = array<i64: 64, 32>}, {pipeline_mode = #tpu.pipeline_mode<synchronous>, transform_indices = @transform_11, window_bounds = array<i64: 1, 32>}, {pipeline_mode = #tpu.pipeline_mode<synchronous>, transform_indices = @transform_12, window_bounds = array<i64: 1, 32>}, {pipeline_mode = #tpu.pipeline_mode<synchronous>, transform_indices = @transform_13, window_bounds = array<i64: 1, 32>}, {transform_indices = @transform_14, window_bounds = array<i64: 1, 8, 32>}, {transform_indices = @transform_15, window_bounds = array<i64: 1, 4, 8, 8>}]} {
    %c0_i32 = arith.constant 0 : i32
    %0 = arith.cmpi eq, %arg1, %c0_i32 : i32
    %1 = arith.extui %0 : i1 to i32
    %c0_i32_0 = arith.constant 0 : i32
    %2 = arith.cmpi ne, %1, %c0_i32_0 : i32
    scf.if %2 {
      %c0_66 = arith.constant 0 : index
      %c0_67 = arith.constant 0 : index
      %c0_68 = arith.constant 0 : index
      %139 = vector.load %arg2[%c0_66, %c0_67, %c0_68] : memref<1x8x32xf32, #tpu.memory_space<vmem>>, vector<1x8x32xf32>
      %140 = vector.shape_cast %139 : vector<1x8x32xf32> to vector<8x32xf32>
      %141 = arith.truncf %140 : vector<8x32xf32> to vector<8x32xbf16>
      %c0_69 = arith.constant 0 : index
      %c0_70 = arith.constant 0 : index
      %142 = vector.load %arg5[%c0_69, %c0_70] : memref<32x32xbf16, #tpu.memory_space<vmem>>, vector<32x32xbf16>
      %cst_71 = arith.constant dense<0.000000e+00> : vector<8x32xf32>
      %143 = tpu.matmul %141, %142, %cst_71 {dimension_numbers = #tpu.dot_dimension_numbers<[1], [0], [0], [1], [0, 0, 1, 1], [], []>} : vector<8x32xbf16>, vector<32x32xbf16>, vector<8x32xf32> -> vector<8x32xf32>
      %c0_72 = arith.constant 0 : index
      %c0_73 = arith.constant 0 : index
      %144 = vector.load %arg6[%c0_72, %c0_73] : memref<32x32xbf16, #tpu.memory_space<vmem>>, vector<32x32xbf16>
      %cst_74 = arith.constant dense<0.000000e+00> : vector<8x32xf32>
      %145 = tpu.matmul %141, %144, %cst_74 {dimension_numbers = #tpu.dot_dimension_numbers<[1], [0], [0], [1], [0, 0, 1, 1], [], []>} : vector<8x32xbf16>, vector<32x32xbf16>, vector<8x32xf32> -> vector<8x32xf32>
      %146 = vector.extract_strided_slice %143 {offsets = [0, 0], sizes = [8, 8], strides = [1, 1]} : vector<8x32xf32> to vector<8x8xf32>
      %147 = arith.truncf %146 : vector<8x8xf32> to vector<8x8xbf16>
      %c0_75 = arith.constant 0 : index
      %c0_76 = arith.constant 0 : index
      %c0_77 = arith.constant 0 : index
      %148 = vector.load %arg18[%c0_75, %c0_76, %c0_77] : memref<4x8x8xbf16, #tpu.memory_space<vmem>>, vector<1x8x8xbf16>
      %149 = vector.shape_cast %148 : vector<1x8x8xbf16> to vector<8x8xbf16>
      %150 = vector.shape_cast %147 : vector<8x8xbf16> to vector<1x8x8xbf16>
      tpu.vector_store %arg18[%c0_75, %c0_76, %c0_77], %150 {strides = array<i32>} : memref<4x8x8xbf16, #tpu.memory_space<vmem>>, vector<1x8x8xbf16>,
      %151 = vector.extract_strided_slice %145 {offsets = [0, 0], sizes = [8, 8], strides = [1, 1]} : vector<8x32xf32> to vector<8x8xf32>
      %152 = arith.truncf %151 : vector<8x8xf32> to vector<8x8xbf16>
      %c0_78 = arith.constant 0 : index
      %c0_79 = arith.constant 0 : index
      %c0_80 = arith.constant 0 : index
      %153 = vector.load %arg19[%c0_78, %c0_79, %c0_80] : memref<4x8x8xbf16, #tpu.memory_space<vmem>>, vector<1x8x8xbf16>
      %154 = vector.shape_cast %153 : vector<1x8x8xbf16> to vector<8x8xbf16>
      %155 = vector.shape_cast %152 : vector<8x8xbf16> to vector<1x8x8xbf16>
      tpu.vector_store %arg19[%c0_78, %c0_79, %c0_80], %155 {strides = array<i32>} : memref<4x8x8xbf16, #tpu.memory_space<vmem>>, vector<1x8x8xbf16>,
      %156 = vector.extract_strided_slice %143 {offsets = [0, 8], sizes = [8, 8], strides = [1, 1]} : vector<8x32xf32> to vector<8x8xf32>
      %157 = arith.truncf %156 : vector<8x8xf32> to vector<8x8xbf16>
      %c1_81 = arith.constant 1 : index
      %c0_82 = arith.constant 0 : index
      %c0_83 = arith.constant 0 : index
      %158 = vector.load %arg18[%c1_81, %c0_82, %c0_83] : memref<4x8x8xbf16, #tpu.memory_space<vmem>>, vector<1x8x8xbf16>
      %159 = vector.shape_cast %158 : vector<1x8x8xbf16> to vector<8x8xbf16>
      %160 = vector.shape_cast %157 : vector<8x8xbf16> to vector<1x8x8xbf16>
      tpu.vector_store %arg18[%c1_81, %c0_82, %c0_83], %160 {strides = array<i32>} : memref<4x8x8xbf16, #tpu.memory_space<vmem>>, vector<1x8x8xbf16>,
      %161 = vector.extract_strided_slice %145 {offsets = [0, 8], sizes = [8, 8], strides = [1, 1]} : vector<8x32xf32> to vector<8x8xf32>
      %162 = arith.truncf %161 : vector<8x8xf32> to vector<8x8xbf16>
      %c1_84 = arith.constant 1 : index
      %c0_85 = arith.constant 0 : index
      %c0_86 = arith.constant 0 : index
      %163 = vector.load %arg19[%c1_84, %c0_85, %c0_86] : memref<4x8x8xbf16, #tpu.memory_space<vmem>>, vector<1x8x8xbf16>
      %164 = vector.shape_cast %163 : vector<1x8x8xbf16> to vector<8x8xbf16>
      %165 = vector.shape_cast %162 : vector<8x8xbf16> to vector<1x8x8xbf16>
      tpu.vector_store %arg19[%c1_84, %c0_85, %c0_86], %165 {strides = array<i32>} : memref<4x8x8xbf16, #tpu.memory_space<vmem>>, vector<1x8x8xbf16>,
      %166 = vector.extract_strided_slice %143 {offsets = [0, 16], sizes = [8, 8], strides = [1, 1]} : vector<8x32xf32> to vector<8x8xf32>
      %167 = arith.truncf %166 : vector<8x8xf32> to vector<8x8xbf16>
      %c2_87 = arith.constant 2 : index
      %c0_88 = arith.constant 0 : index
      %c0_89 = arith.constant 0 : index
      %168 = vector.load %arg18[%c2_87, %c0_88, %c0_89] : memref<4x8x8xbf16, #tpu.memory_space<vmem>>, vector<1x8x8xbf16>
      %169 = vector.shape_cast %168 : vector<1x8x8xbf16> to vector<8x8xbf16>
      %170 = vector.shape_cast %167 : vector<8x8xbf16> to vector<1x8x8xbf16>
      tpu.vector_store %arg18[%c2_87, %c0_88, %c0_89], %170 {strides = array<i32>} : memref<4x8x8xbf16, #tpu.memory_space<vmem>>, vector<1x8x8xbf16>,
      %171 = vector.extract_strided_slice %145 {offsets = [0, 16], sizes = [8, 8], strides = [1, 1]} : vector<8x32xf32> to vector<8x8xf32>
      %172 = arith.truncf %171 : vector<8x8xf32> to vector<8x8xbf16>
      %c2_90 = arith.constant 2 : index
      %c0_91 = arith.constant 0 : index
      %c0_92 = arith.constant 0 : index
      %173 = vector.load %arg19[%c2_90, %c0_91, %c0_92] : memref<4x8x8xbf16, #tpu.memory_space<vmem>>, vector<1x8x8xbf16>
      %174 = vector.shape_cast %173 : vector<1x8x8xbf16> to vector<8x8xbf16>
      %175 = vector.shape_cast %172 : vector<8x8xbf16> to vector<1x8x8xbf16>
      tpu.vector_store %arg19[%c2_90, %c0_91, %c0_92], %175 {strides = array<i32>} : memref<4x8x8xbf16, #tpu.memory_space<vmem>>, vector<1x8x8xbf16>,
      %176 = vector.extract_strided_slice %143 {offsets = [0, 24], sizes = [8, 8], strides = [1, 1]} : vector<8x32xf32> to vector<8x8xf32>
      %177 = arith.truncf %176 : vector<8x8xf32> to vector<8x8xbf16>
      %c3_93 = arith.constant 3 : index
      %c0_94 = arith.constant 0 : index
      %c0_95 = arith.constant 0 : index
      %178 = vector.load %arg18[%c3_93, %c0_94, %c0_95] : memref<4x8x8xbf16, #tpu.memory_space<vmem>>, vector<1x8x8xbf16>
      %179 = vector.shape_cast %178 : vector<1x8x8xbf16> to vector<8x8xbf16>
      %180 = vector.shape_cast %177 : vector<8x8xbf16> to vector<1x8x8xbf16>
      tpu.vector_store %arg18[%c3_93, %c0_94, %c0_95], %180 {strides = array<i32>} : memref<4x8x8xbf16, #tpu.memory_space<vmem>>, vector<1x8x8xbf16>,
      %181 = vector.extract_strided_slice %145 {offsets = [0, 24], sizes = [8, 8], strides = [1, 1]} : vector<8x32xf32> to vector<8x8xf32>
      %182 = arith.truncf %181 : vector<8x8xf32> to vector<8x8xbf16>
      %c3_96 = arith.constant 3 : index
      %c0_97 = arith.constant 0 : index
      %c0_98 = arith.constant 0 : index
      %183 = vector.load %arg19[%c3_96, %c0_97, %c0_98] : memref<4x8x8xbf16, #tpu.memory_space<vmem>>, vector<1x8x8xbf16>
      %184 = vector.shape_cast %183 : vector<1x8x8xbf16> to vector<8x8xbf16>
      %185 = vector.shape_cast %182 : vector<8x8xbf16> to vector<1x8x8xbf16>
      tpu.vector_store %arg19[%c3_96, %c0_97, %c0_98], %185 {strides = array<i32>} : memref<4x8x8xbf16, #tpu.memory_space<vmem>>, vector<1x8x8xbf16>,
    } else {
    }
    %c8_i32 = arith.constant 8 : i32
    %3 = arith.muli %arg1, %c8_i32 : i32
    %4 = tpu.assume_multiple %3, 8 : i32
    %c0 = arith.constant 0 : index
    %5 = arith.index_cast %4 : i32 to index
    %c0_1 = arith.constant 0 : index
    %6 = vector.load %arg2[%c0, %5, %c0_1] : memref<1x8x32xf32, #tpu.memory_space<vmem>>, vector<1x8x32xf32>
    %7 = vector.shape_cast %6 : vector<1x8x32xf32> to vector<8x32xf32>
    %8 = arith.truncf %7 : vector<8x32xf32> to vector<8x32xbf16>
    %c0_2 = arith.constant 0 : index
    %c0_3 = arith.constant 0 : index
    %9 = vector.load %arg4[%c0_2, %c0_3] : memref<32x32xbf16, #tpu.memory_space<vmem>>, vector<32x32xbf16>
    %cst = arith.constant dense<0.000000e+00> : vector<8x32xf32>
    %10 = tpu.matmul %8, %9, %cst {dimension_numbers = #tpu.dot_dimension_numbers<[1], [0], [0], [1], [0, 0, 1, 1], [], []>} : vector<8x32xbf16>, vector<32x32xbf16>, vector<8x32xf32> -> vector<8x32xf32>
    %c0_4 = arith.constant 0 : index
    %c0_5 = arith.constant 0 : index
    %c0_6 = arith.constant 0 : index
    %11 = vector.load %arg3[%c0_4, %c0_5, %c0_6] : memref<1x8x8xbf16, #tpu.memory_space<vmem>>, vector<1x8x8xbf16>
    %12 = vector.shape_cast %11 : vector<1x8x8xbf16> to vector<8x8xbf16>
    %13 = arith.extf %12 : vector<8x8xbf16> to vector<8x8xf32>
    %14 = vector.shape_cast %13 : vector<8x8xf32> to vector<1x8x8xf32>
    %15 = vector.extract_strided_slice %10 {offsets = [0, 0], sizes = [8, 8], strides = [1, 1]} : vector<8x32xf32> to vector<8x8xf32>
    %16 = vector.extract_strided_slice %10 {offsets = [0, 8], sizes = [8, 8], strides = [1, 1]} : vector<8x32xf32> to vector<8x8xf32>
    %17 = vector.extract_strided_slice %10 {offsets = [0, 16], sizes = [8, 8], strides = [1, 1]} : vector<8x32xf32> to vector<8x8xf32>
    %18 = vector.extract_strided_slice %10 {offsets = [0, 24], sizes = [8, 8], strides = [1, 1]} : vector<8x32xf32> to vector<8x8xf32>
    %19 = vector.shape_cast %15 : vector<8x8xf32> to vector<1x8x8xf32>
    %20 = vector.shape_cast %16 : vector<8x8xf32> to vector<1x8x8xf32>
    %21 = vector.shape_cast %17 : vector<8x8xf32> to vector<1x8x8xf32>
    %22 = vector.shape_cast %18 : vector<8x8xf32> to vector<1x8x8xf32>
    %23 = tpu.concatenate %19, %20, %21, %22 in 0 : vector<1x8x8xf32>, vector<1x8x8xf32>, vector<1x8x8xf32>, vector<1x8x8xf32> -> vector<4x8x8xf32>
    %24 = arith.truncf %23 : vector<4x8x8xf32> to vector<4x8x8xbf16>
    %c0_7 = arith.constant 0 : index
    %c0_8 = arith.constant 0 : index
    %c0_9 = arith.constant 0 : index
    %25 = vector.load %arg18[%c0_7, %c0_8, %c0_9] : memref<4x8x8xbf16, #tpu.memory_space<vmem>>, vector<4x8x8xbf16>
    %c0_10 = arith.constant 0 : index
    %c0_11 = arith.constant 0 : index
    %c0_12 = arith.constant 0 : index
    %26 = vector.load %arg19[%c0_10, %c0_11, %c0_12] : memref<4x8x8xbf16, #tpu.memory_space<vmem>>, vector<4x8x8xbf16>
    "tpu.trace_start"() <{level = 10 : i32, message = "hqd,hkd->hqk"}> : () -> ()
    %cst_13 = arith.constant dense<0.000000e+00> : vector<4x8x8xf32>
    %27 = tpu.matmul %24, %25, %cst_13 {dimension_numbers = #tpu.dot_dimension_numbers<[2], [2], [1], [1], [0, 0, 0, 1, 1, 1], [0], [0]>} : vector<4x8x8xbf16>, vector<4x8x8xbf16>, vector<4x8x8xf32> -> vector<4x8x8xf32>
    "tpu.trace_stop"() : () -> ()
    %28 = vector.broadcast %14 : vector<1x8x8xf32> to vector<4x8x8xf32>
    %29 = arith.addf %27, %28 : vector<4x8x8xf32>
    %cst_14 = arith.constant dense<0xFF800000> : vector<4x8xf32>
    %30 = vector.multi_reduction <maximumf>, %29, %cst_14 [2] : vector<4x8x8xf32> to vector<4x8xf32>
    %31 = vector.shape_cast %30 : vector<4x8xf32> to vector<4x8x1xf32>
    %32 = vector.broadcast %31 : vector<4x8x1xf32> to vector<4x8x8xf32>
    %33 = arith.subf %29, %32 : vector<4x8x8xf32>
    %34 = math.exp %33 : vector<4x8x8xf32>
    %cst_15 = arith.constant dense<0.000000e+00> : vector<4x8xf32>
    %35 = vector.multi_reduction <add>, %34, %cst_15 [2] : vector<4x8x8xf32> to vector<4x8xf32>
    %36 = vector.shape_cast %35 : vector<4x8xf32> to vector<4x8x1xf32>
    %37 = tpu.reciprocal %36 {approx = true} : vector<4x8x1xf32> -> vector<4x8x1xf32>
    %38 = vector.broadcast %37 : vector<4x8x1xf32> to vector<4x8x8xf32>
    %39 = arith.mulf %34, %38 : vector<4x8x8xf32>
    %c0_16 = arith.constant 0 : index
    %c0_17 = arith.constant 0 : index
    %c0_18 = arith.constant 0 : index
    %c0_19 = arith.constant 0 : index
    %40 = vector.load %arg17[%c0_16, %c0_17, %c0_18, %c0_19] : memref<1x4x8x8xf32, #tpu.memory_space<vmem>>, vector<1x4x8x8xf32>
    %41 = vector.shape_cast %40 : vector<1x4x8x8xf32> to vector<4x8x8xf32>
    %42 = vector.shape_cast %39 : vector<4x8x8xf32> to vector<1x4x8x8xf32>
    tpu.vector_store %arg17[%c0_16, %c0_17, %c0_18, %c0_19], %42 {strides = array<i32>} : memref<1x4x8x8xf32, #tpu.memory_space<vmem>>, vector<1x4x8x8xf32>,
    %43 = arith.truncf %39 : vector<4x8x8xf32> to vector<4x8x8xbf16>
    "tpu.trace_start"() <{level = 10 : i32, message = "hqk,hkd->hqd"}> : () -> ()
    %cst_20 = arith.constant dense<0.000000e+00> : vector<4x8x8xf32>
    %44 = tpu.matmul %43, %26, %cst_20 {dimension_numbers = #tpu.dot_dimension_numbers<[2], [1], [1], [2], [0, 0, 0, 1, 1, 2], [0], [0]>} : vector<4x8x8xbf16>, vector<4x8x8xbf16>, vector<4x8x8xf32> -> vector<4x8x8xf32>
    "tpu.trace_stop"() : () -> ()
    %45 = vector.extract_strided_slice %44 {offsets = [0, 0, 0], sizes = [1, 8, 8], strides = [1, 1, 1]} : vector<4x8x8xf32> to vector<1x8x8xf32>
    %46 = vector.shape_cast %45 : vector<1x8x8xf32> to vector<8x8xf32>
    %47 = arith.truncf %46 : vector<8x8xf32> to vector<8x8xbf16>
    %c0_21 = arith.constant 0 : index
    %c0_22 = arith.constant 0 : index
    %c0_23 = arith.constant 0 : index
    %48 = vector.load %arg7[%c0_21, %c0_22, %c0_23] : memref<4x8x32xbf16, #tpu.memory_space<vmem>>, vector<1x8x32xbf16>
    %49 = vector.shape_cast %48 : vector<1x8x32xbf16> to vector<8x32xbf16>
    %cst_24 = arith.constant dense<0.000000e+00> : vector<8x32xf32>
    %50 = tpu.matmul %47, %49, %cst_24 {dimension_numbers = #tpu.dot_dimension_numbers<[1], [0], [0], [1], [0, 0, 1, 1], [], []>} : vector<8x8xbf16>, vector<8x32xbf16>, vector<8x32xf32> -> vector<8x32xf32>
    %51 = arith.addf %7, %50 : vector<8x32xf32>
    %52 = vector.extract_strided_slice %44 {offsets = [1, 0, 0], sizes = [1, 8, 8], strides = [1, 1, 1]} : vector<4x8x8xf32> to vector<1x8x8xf32>
    %53 = vector.shape_cast %52 : vector<1x8x8xf32> to vector<8x8xf32>
    %54 = arith.truncf %53 : vector<8x8xf32> to vector<8x8xbf16>
    %c1 = arith.constant 1 : index
    %c0_25 = arith.constant 0 : index
    %c0_26 = arith.constant 0 : index
    %55 = vector.load %arg7[%c1, %c0_25, %c0_26] : memref<4x8x32xbf16, #tpu.memory_space<vmem>>, vector<1x8x32xbf16>
    %56 = vector.shape_cast %55 : vector<1x8x32xbf16> to vector<8x32xbf16>
    %cst_27 = arith.constant dense<0.000000e+00> : vector<8x32xf32>
    %57 = tpu.matmul %54, %56, %cst_27 {dimension_numbers = #tpu.dot_dimension_numbers<[1], [0], [0], [1], [0, 0, 1, 1], [], []>} : vector<8x8xbf16>, vector<8x32xbf16>, vector<8x32xf32> -> vector<8x32xf32>
    %58 = arith.addf %51, %57 : vector<8x32xf32>
    %59 = vector.extract_strided_slice %44 {offsets = [2, 0, 0], sizes = [1, 8, 8], strides = [1, 1, 1]} : vector<4x8x8xf32> to vector<1x8x8xf32>
    %60 = vector.shape_cast %59 : vector<1x8x8xf32> to vector<8x8xf32>
    %61 = arith.truncf %60 : vector<8x8xf32> to vector<8x8xbf16>
    %c2 = arith.constant 2 : index
    %c0_28 = arith.constant 0 : index
    %c0_29 = arith.constant 0 : index
    %62 = vector.load %arg7[%c2, %c0_28, %c0_29] : memref<4x8x32xbf16, #tpu.memory_space<vmem>>, vector<1x8x32xbf16>
    %63 = vector.shape_cast %62 : vector<1x8x32xbf16> to vector<8x32xbf16>
    %cst_30 = arith.constant dense<0.000000e+00> : vector<8x32xf32>
    %64 = tpu.matmul %61, %63, %cst_30 {dimension_numbers = #tpu.dot_dimension_numbers<[1], [0], [0], [1], [0, 0, 1, 1], [], []>} : vector<8x8xbf16>, vector<8x32xbf16>, vector<8x32xf32> -> vector<8x32xf32>
    %65 = arith.addf %58, %64 : vector<8x32xf32>
    %66 = vector.extract_strided_slice %44 {offsets = [3, 0, 0], sizes = [1, 8, 8], strides = [1, 1, 1]} : vector<4x8x8xf32> to vector<1x8x8xf32>
    %67 = vector.shape_cast %66 : vector<1x8x8xf32> to vector<8x8xf32>
    %68 = arith.truncf %67 : vector<8x8xf32> to vector<8x8xbf16>
    %c3 = arith.constant 3 : index
    %c0_31 = arith.constant 0 : index
    %c0_32 = arith.constant 0 : index
    %69 = vector.load %arg7[%c3, %c0_31, %c0_32] : memref<4x8x32xbf16, #tpu.memory_space<vmem>>, vector<1x8x32xbf16>
    %70 = vector.shape_cast %69 : vector<1x8x32xbf16> to vector<8x32xbf16>
    %cst_33 = arith.constant dense<0.000000e+00> : vector<8x32xf32>
    %71 = tpu.matmul %68, %70, %cst_33 {dimension_numbers = #tpu.dot_dimension_numbers<[1], [0], [0], [1], [0, 0, 1, 1], [], []>} : vector<8x8xbf16>, vector<8x32xbf16>, vector<8x32xf32> -> vector<8x32xf32>
    %72 = arith.addf %65, %71 : vector<8x32xf32>
    %cst_34 = arith.constant dense<0.000000e+00> : vector<8xf32>
    %73 = vector.multi_reduction <add>, %72, %cst_34 [1] : vector<8x32xf32> to vector<8xf32>
    %74 = vector.shape_cast %73 : vector<8xf32> to vector<8x1xf32>
    %cst_35 = arith.constant 3.200000e+01 : f32
    %75 = vector.broadcast %cst_35 : f32 to vector<8x1xf32>
    %76 = arith.divf %74, %75 : vector<8x1xf32>
    %77 = vector.broadcast %76 : vector<8x1xf32> to vector<8x32xf32>
    %78 = arith.subf %72, %77 : vector<8x32xf32>
    %79 = arith.mulf %78, %78 : vector<8x32xf32>
    %cst_36 = arith.constant dense<0.000000e+00> : vector<8xf32>
    %80 = vector.multi_reduction <add>, %79, %cst_36 [1] : vector<8x32xf32> to vector<8xf32>
    %81 = vector.shape_cast %80 : vector<8xf32> to vector<8x1xf32>
    %cst_37 = arith.constant 3.200000e+01 : f32
    %82 = vector.broadcast %cst_37 : f32 to vector<8x1xf32>
    %83 = arith.divf %81, %82 : vector<8x1xf32>
    %84 = vector.broadcast %76 : vector<8x1xf32> to vector<8x32xf32>
    %85 = arith.subf %72, %84 : vector<8x32xf32>
    %cst_38 = arith.constant 9.99999997E-7 : f32
    %86 = vector.broadcast %cst_38 : f32 to vector<8x1xf32>
    %87 = arith.addf %83, %86 : vector<8x1xf32>
    %88 = math.rsqrt %87 : vector<8x1xf32>
    %89 = vector.broadcast %88 : vector<8x1xf32> to vector<8x32xf32>
    %90 = arith.mulf %85, %89 : vector<8x32xf32>
    %c0_39 = arith.constant 0 : index
    %c0_40 = arith.constant 0 : index
    %91 = vector.load %arg8[%c0_39, %c0_40] : memref<1x32xf32, #tpu.memory_space<vmem>>, vector<1x32xf32>
    %92 = vector.broadcast %91 : vector<1x32xf32> to vector<8x32xf32>
    %93 = arith.mulf %90, %92 : vector<8x32xf32>
    %c0_41 = arith.constant 0 : index
    %c0_42 = arith.constant 0 : index
    %94 = vector.load %arg9[%c0_41, %c0_42] : memref<1x32xf32, #tpu.memory_space<vmem>>, vector<1x32xf32>
    %95 = vector.broadcast %94 : vector<1x32xf32> to vector<8x32xf32>
    %96 = arith.addf %93, %95 : vector<8x32xf32>
    %97 = arith.truncf %96 : vector<8x32xf32> to vector<8x32xbf16>
    %c0_43 = arith.constant 0 : index
    %c0_44 = arith.constant 0 : index
    %98 = vector.load %arg10[%c0_43, %c0_44] : memref<32x64xbf16, #tpu.memory_space<vmem>>, vector<32x64xbf16>
    %cst_45 = arith.constant dense<0.000000e+00> : vector<8x64xf32>
    %99 = tpu.matmul %97, %98, %cst_45 {dimension_numbers = #tpu.dot_dimension_numbers<[1], [0], [0], [1], [0, 0, 1, 1], [], []>} : vector<8x32xbf16>, vector<32x64xbf16>, vector<8x64xf32> -> vector<8x64xf32>
    %c0_46 = arith.constant 0 : index
    %c0_47 = arith.constant 0 : index
    %100 = vector.load %arg11[%c0_46, %c0_47] : memref<1x64xf32, #tpu.memory_space<vmem>>, vector<1x64xf32>
    %101 = vector.broadcast %100 : vector<1x64xf32> to vector<8x64xf32>
    %102 = arith.addf %99, %101 : vector<8x64xf32>
    %cst_48 = arith.constant 0.000000e+00 : f32
    %103 = vector.broadcast %cst_48 : f32 to vector<8x64xf32>
    %104 = arith.maximumf %102, %103 : vector<8x64xf32>
    %105 = arith.truncf %104 : vector<8x64xf32> to vector<8x64xbf16>
    %c0_49 = arith.constant 0 : index
    %c0_50 = arith.constant 0 : index
    %106 = vector.load %arg12[%c0_49, %c0_50] : memref<64x32xbf16, #tpu.memory_space<vmem>>, vector<64x32xbf16>
    %cst_51 = arith.constant dense<0.000000e+00> : vector<8x32xf32>
    %107 = tpu.matmul %105, %106, %cst_51 {dimension_numbers = #tpu.dot_dimension_numbers<[1], [0], [0], [1], [0, 0, 1, 1], [], []>} : vector<8x64xbf16>, vector<64x32xbf16>, vector<8x32xf32> -> vector<8x32xf32>
    %c0_52 = arith.constant 0 : index
    %c0_53 = arith.constant 0 : index
    %108 = vector.load %arg13[%c0_52, %c0_53] : memref<1x32xf32, #tpu.memory_space<vmem>>, vector<1x32xf32>
    %109 = vector.broadcast %108 : vector<1x32xf32> to vector<8x32xf32>
    %110 = arith.addf %107, %109 : vector<8x32xf32>
    %111 = arith.addf %110, %96 : vector<8x32xf32>
    %cst_54 = arith.constant dense<0.000000e+00> : vector<8xf32>
    %112 = vector.multi_reduction <add>, %111, %cst_54 [1] : vector<8x32xf32> to vector<8xf32>
    %113 = vector.shape_cast %112 : vector<8xf32> to vector<8x1xf32>
    %cst_55 = arith.constant 3.200000e+01 : f32
    %114 = vector.broadcast %cst_55 : f32 to vector<8x1xf32>
    %115 = arith.divf %113, %114 : vector<8x1xf32>
    %116 = vector.broadcast %115 : vector<8x1xf32> to vector<8x32xf32>
    %117 = arith.subf %111, %116 : vector<8x32xf32>
    %118 = arith.mulf %117, %117 : vector<8x32xf32>
    %cst_56 = arith.constant dense<0.000000e+00> : vector<8xf32>
    %119 = vector.multi_reduction <add>, %118, %cst_56 [1] : vector<8x32xf32> to vector<8xf32>
    %120 = vector.shape_cast %119 : vector<8xf32> to vector<8x1xf32>
    %cst_57 = arith.constant 3.200000e+01 : f32
    %121 = vector.broadcast %cst_57 : f32 to vector<8x1xf32>
    %122 = arith.divf %120, %121 : vector<8x1xf32>
    %123 = vector.broadcast %115 : vector<8x1xf32> to vector<8x32xf32>
    %124 = arith.subf %111, %123 : vector<8x32xf32>
    %cst_58 = arith.constant 9.99999997E-7 : f32
    %125 = vector.broadcast %cst_58 : f32 to vector<8x1xf32>
    %126 = arith.addf %122, %125 : vector<8x1xf32>
    %127 = math.rsqrt %126 : vector<8x1xf32>
    %128 = vector.broadcast %127 : vector<8x1xf32> to vector<8x32xf32>
    %129 = arith.mulf %124, %128 : vector<8x32xf32>
    %c0_59 = arith.constant 0 : index
    %c0_60 = arith.constant 0 : index
    %130 = vector.load %arg14[%c0_59, %c0_60] : memref<1x32xf32, #tpu.memory_space<vmem>>, vector<1x32xf32>
    %131 = vector.broadcast %130 : vector<1x32xf32> to vector<8x32xf32>
    %132 = arith.mulf %129, %131 : vector<8x32xf32>
    %c0_61 = arith.constant 0 : index
    %c0_62 = arith.constant 0 : index
    %133 = vector.load %arg15[%c0_61, %c0_62] : memref<1x32xf32, #tpu.memory_space<vmem>>, vector<1x32xf32>
    %134 = vector.broadcast %133 : vector<1x32xf32> to vector<8x32xf32>
    %135 = arith.addf %132, %134 : vector<8x32xf32>
    %c0_63 = arith.constant 0 : index
    %c0_64 = arith.constant 0 : index
    %c0_65 = arith.constant 0 : index
    %136 = vector.load %arg16[%c0_63, %c0_64, %c0_65] : memref<1x8x32xf32, #tpu.memory_space<vmem>>, vector<1x8x32xf32>
    %137 = vector.shape_cast %136 : vector<1x8x32xf32> to vector<8x32xf32>
    %138 = vector.shape_cast %135 : vector<8x32xf32> to vector<1x8x32xf32>
    tpu.vector_store %arg16[%c0_63, %c0_64, %c0_65], %138 {strides = array<i32>} : memref<1x8x32xf32, #tpu.memory_space<vmem>>, vector<1x8x32xf32>,
    return
  }
  func.func @transform_0(%arg0: i32, %arg1: i32) -> (i32, i32, i32) {
    %c0_i32 = arith.constant 0 : i32
    %c0_i32_0 = arith.constant 0 : i32
    %c0_i32_1 = arith.constant 0 : i32
    return %arg0, %c0_i32, %c0_i32_0 : i32, i32, i32
  }
  func.func @transform_1(%arg0: i32, %arg1: i32) -> (i32, i32, i32) {
    %c0_i32 = arith.constant 0 : i32
    %c0_i32_0 = arith.constant 0 : i32
    return %arg0, %arg1, %c0_i32 : i32, i32, i32
  }
  func.func @transform_2(%arg0: i32, %arg1: i32) -> (i32, i32) {
    %c0_i32 = arith.constant 0 : i32
    %c0_i32_0 = arith.constant 0 : i32
    %c0_i32_1 = arith.constant 0 : i32
    return %c0_i32, %c0_i32_0 : i32, i32
  }
  func.func @transform_3(%arg0: i32, %arg1: i32) -> (i32, i32) {
    %c0_i32 = arith.constant 0 : i32
    %c0_i32_0 = arith.constant 0 : i32
    %c0_i32_1 = arith.constant 0 : i32
    return %c0_i32, %c0_i32_0 : i32, i32
  }
  func.func @transform_4(%arg0: i32, %arg1: i32) -> (i32, i32) {
    %c0_i32 = arith.constant 0 : i32
    %c0_i32_0 = arith.constant 0 : i32
    %c0_i32_1 = arith.constant 0 : i32
    return %c0_i32, %c0_i32_0 : i32, i32
  }
  func.func @transform_5(%arg0: i32, %arg1: i32) -> (i32, i32, i32) {
    %c0_i32 = arith.constant 0 : i32
    %c0_i32_0 = arith.constant 0 : i32
    %c0_i32_1 = arith.constant 0 : i32
    %c0_i32_2 = arith.constant 0 : i32
    return %c0_i32, %c0_i32_0, %c0_i32_1 : i32, i32, i32
  }
  func.func @transform_6(%arg0: i32, %arg1: i32) -> (i32, i32) {
    %c0_i32 = arith.constant 0 : i32
    %c0_i32_0 = arith.constant 0 : i32
    %c0_i32_1 = arith.constant 0 : i32
    return %c0_i32, %c0_i32_0 : i32, i32
  }
  func.func @transform_7(%arg0: i32, %arg1: i32) -> (i32, i32) {
    %c0_i32 = arith.constant 0 : i32
    %c0_i32_0 = arith.constant 0 : i32
    %c0_i32_1 = arith.constant 0 : i32
    return %c0_i32, %c0_i32_0 : i32, i32
  }
  func.func @transform_8(%arg0: i32, %arg1: i32) -> (i32, i32) {
    %c0_i32 = arith.constant 0 : i32
    %c0_i32_0 = arith.constant 0 : i32
    %c0_i32_1 = arith.constant 0 : i32
    return %c0_i32, %c0_i32_0 : i32, i32
  }
  func.func @transform_9(%arg0: i32, %arg1: i32) -> (i32, i32) {
    %c0_i32 = arith.constant 0 : i32
    %c0_i32_0 = arith.constant 0 : i32
    %c0_i32_1 = arith.constant 0 : i32
    return %c0_i32, %c0_i32_0 : i32, i32
  }
  func.func @transform_10(%arg0: i32, %arg1: i32) -> (i32, i32) {
    %c0_i32 = arith.constant 0 : i32
    %c0_i32_0 = arith.constant 0 : i32
    %c0_i32_1 = arith.constant 0 : i32
    return %c0_i32, %c0_i32_0 : i32, i32
  }
  func.func @transform_11(%arg0: i32, %arg1: i32) -> (i32, i32) {
    %c0_i32 = arith.constant 0 : i32
    %c0_i32_0 = arith.constant 0 : i32
    %c0_i32_1 = arith.constant 0 : i32
    return %c0_i32, %c0_i32_0 : i32, i32
  }
  func.func @transform_12(%arg0: i32, %arg1: i32) -> (i32, i32) {
    %c0_i32 = arith.constant 0 : i32
    %c0_i32_0 = arith.constant 0 : i32
    %c0_i32_1 = arith.constant 0 : i32
    return %c0_i32, %c0_i32_0 : i32, i32
  }
  func.func @transform_13(%arg0: i32, %arg1: i32) -> (i32, i32) {
    %c0_i32 = arith.constant 0 : i32
    %c0_i32_0 = arith.constant 0 : i32
    %c0_i32_1 = arith.constant 0 : i32
    return %c0_i32, %c0_i32_0 : i32, i32
  }
  func.func @transform_14(%arg0: i32, %arg1: i32) -> (i32, i32, i32) {
    %c0_i32 = arith.constant 0 : i32
    %c0_i32_0 = arith.constant 0 : i32
    return %arg0, %arg1, %c0_i32 : i32, i32, i32
  }
  func.func @transform_15(%arg0: i32, %arg1: i32) -> (i32, i32, i32, i32) {
    %c0_i32 = arith.constant 0 : i32
    %c0_i32_0 = arith.constant 0 : i32
    %c0_i32_1 = arith.constant 0 : i32
    return %arg0, %c0_i32, %arg1, %c0_i32_0 : i32, i32, i32, i32
  }
}

</mosaic_0001>

<bundles_post_ra>
// kernel: _encoder_layer_impl.1
= control target key start
LH: loop header
LB: loop body
LE: loop exit
PB: predicated region body
PF: predicated region fallthrough
CT: control target
= control target key end

     0   :  { %s2676_s0 = inlined_call_operand.vmem [shape: f32[2,8,32], index: 0, kind: input, shape index: {}]   ;;  %s2677_s1 = inlined_call_operand.vmem [shape: bf16[2,8,8], index: 1, kind: input, shape index: {}]   ;;  %s2678_s2 = inlined_call_operand.vmem [shape: bf16[32,32], index: 2, kind: input, shape index: {}]   ;;  %s2679_s3 = inlined_call_operand.vmem [shape: bf16[32,32], index: 3, kind: input, shape index: {}]   ;;  %s2680_s4 = inlined_call_operand.vmem [shape: bf16[32,32], index: 4, kind: input, shape index: {}]   ;;  %s2681_s5 = inlined_call_operand.vmem [shape: bf16[4,8,32], index: 5, kind: input, shape index: {}]   ;;  %s2682_s6 = inlined_call_operand.vmem [shape: f32[1,32], index: 6, kind: input, shape index: {}]   ;;  %s2683_s7 = inlined_call_operand.vmem [shape: f32[1,32], index: 7, kind: input, shape index: {}]   ;;  %s2684_s8 = inlined_call_operand.vmem [shape: bf16[32,64], index: 8, kind: input, shape index: {}]   ;;  %s2685_s9 = inlined_call_operand.vmem [shape: f32[1,64], index: 9, kind: input, shape index: {}]   ;;  %s2686_s10 = inlined_call_operand.vmem [shape: bf16[64,32], index: 10, kind: input, shape index: {}]   ;;  %s2687_s11 = inlined_call_operand.vmem [shape: f32[1,32], index: 11, kind: input, shape index: {}]   ;;  %s2688_s12 = inlined_call_operand.vmem [shape: f32[1,32], index: 12, kind: input, shape index: {}]   ;;  %s2689_s13 = inlined_call_operand.vmem [shape: f32[1,32], index: 13, kind: input, shape index: {}]   ;;  %s2690_s14 = inlined_call_operand.hbm [shape: f32[2,8,32], index: 14, kind: output, shape index: {0}]   ;;  %s2691_s15 = inlined_call_operand.hbm [shape: f32[2,4,8,8], index: 15, kind: output, shape index: {1}]  }
   0x1   :  { %2694 = sst [smem:[#allocation13_spill]] %s2676_s0 }
   0x2   :  { %2695 = sst [smem:[#allocation14_spill]] %s2677_s1 }
   0x3   :  { %2696 = sst [smem:[#allocation15_spill]] %s2678_s2 }
   0x4   :  { %2697 = sst [smem:[#allocation16_spill]] %s2679_s3 }
   0x5   :  { %2698 = sst [smem:[#allocation17_spill]] %s2680_s4 }
   0x6   :  { %21 = vsyncpa [#allocation5], 0 }
   0x7   :  { %23 = vsyncpa [#allocation5 + $0x1], 0 }
   0x8   :  { %24 = vsyncpa [#allocation7], 0 }
   0x9   :  { %26 = vsyncpa [#allocation7 + $0x1], 0  ;;  %s2316_s18 = smov 0   ;;  %s2318_s19 = smov 0  }
   0xa   :  { %s2320_s20 = smov 0   ;;  %s2322_s21 = smov 0  }
   0xb   :  { %s2324_s22 = smov 0   ;;  %s2326_s23 = smov 0  }
   0xc LB: > { %2699 = sst [smem:[#allocation10_spill]] %s2221_s22  ;;  %s1787_s24 = sadd.s32 4294967295, %s2225_s23   ;;  %s2225_s23 = sphi %s2326_s23, %s32_s23   ;;  %s2221_s22 = sphi %s2324_s22, %s2712_s22   ;;  %s2217_s21 = sphi %s2322_s21, %s2711_s21   ;;  %s2213_s20 = sphi %s2320_s20, %s2715_s20   ;;  %s2209_s19 = sphi %s2318_s19, %s2714_s19   ;;  %s2205_s18 = sphi %s2316_s18, %s2713_s18  }
   0xd   : > { %s1788_s25 = sadd.s32 4294967294, %s2225_s23   ;;  %s44_s26 = sadd.s32 1, %s2221_s22 }
   0xe   : > { %s359_s27 = sadd.s32 1, %s2213_s20  ;;  %p46_p0 = scmp.ge.s32.totalorder %s44_s26, 2 }
   0xf   : > { %p369_p1 = scmp.ne.s32.totalorder %s2213_s20, %s2209_s19  ;;  %p370_p2 = scmp.eq.s32.totalorder %s1787_s24, 1 }
  0x10   : > { %p375_p3 = scmp.ne.s32.totalorder %s2209_s19, %s2205_s18  ;;  %s2717_s26 = smov (%p46_p0, %s44_s26), 0 }
  0x11   : > { %2700 = sst [smem:[#allocation11_spill]] %s2717_s26  ;;  %p2356_p4 = por %p370_p2, %p369_p1 }
  0x12   : > { %p376_p5 = scmp.eq.s32.totalorder %s1788_s25, 1  ;;  %s354_s29 = ssub.s32 %s2221_s22, %s2717_s26 }
  0x13   : > { %p1791_p6 = scmp.ge.s32.totalorder %s2225_s23, 1  ;;  %p357_p7 = scmp.eq.s32.totalorder %s354_s29, 0 }
  0x14   : > { %p2363_p8 = por %p376_p5, %p375_p3  ;;  %p475_p9 = scmp.lt.s32.totalorder %s2225_s23, 3 }
  0x15   : > { %s2369_s16 = scalar_select %p357_p7, %s2213_s20, %s359_s27  }
  0x16   : > { %p476_p10 = pnand %p1791_p6, %p475_p9 }
  0x17   : > { %2703 = sst [smem:[#allocation12_spill]] %s2369_s16  ;;  %s2704_s3 = sld [smem:[#allocation16_spill]] (!%p476_p10)  ;;  %v2227_v1 = vmov (!%p476_p10), 0.0   ;;  %vm2228_vm0 = vmmov (!%p476_p10), 0   ;;  %vm568_vm1 = vcmask (!%p476_p10), 261120   ;;  %vm669_vm2 = vcmask (!%p476_p10), 60416  }
  0x18   : > { %479 = sbr.rel (%p476_p10) target bundleno = 2442 (0x98a), region = 76  ;;  %1887 = vmatprep.subr.bf16.mxu0 (!%p476_p10), %v2227_v1  ;;  %1895 = vmatprep.subr.bf16.mxu1 (!%p476_p10), %v2227_v1  ;;  %p534_p11 = scmp.lt.s32.totalorder (!%p476_p10), %s2217_s21, 1  ;;  %vm797_vm3 = vcmask (!%p476_p10), 64512   ;;  %vm1037_vm4 = vcmask (!%p476_p10), 1043456   ;;  %vm1556_vm5 = vcmask (!%p476_p10), 523264  }
  0x19   : > { %1891 = vmatprep.mubr.msk.bf16.mxu0 (!%p476_p10), %vm2228_vm0, %v2227_v1  ;;  %1899 = vmatprep.mubr.msk.bf16.mxu1 (!%p476_p10), %vm2228_vm0, %v2227_v1  ;;  %s2705_s4 = sld [smem:[#allocation17_spill]] (!%p476_p10)  ;;  %s2706_s2 = sld [smem:[#allocation15_spill]] (!%p476_p10) }
  0x1a   : > { %s2707_s0 = sld [smem:[#allocation13_spill]] (!%p476_p10)  ;;  %s2230_s24 = smov (!%p476_p10), 112  }
  0x1b   : > { %s2708_s1 = sld [smem:[#allocation14_spill]] (!%p476_p10)  ;;  %s2232_s17 = smov (!%p476_p10), [#allocation6]  }
  0x1d   : > { %v2083_v0 = vld [vmem:[%s2704_s3] sm:$0xff] (!%p476_p10)   ;;  %v2084_v2 = vld [vmem:[%s2704_s3 + $0x8] sm:$0xff] (!%p476_p10)  }
  0x1e   : > { %1888 = vmatpush3.bf16.msra.mxu0 (!%p476_p10), %v2083_v0 }
  0x1f   : > { %1889 = vmatprep.subr.bf16.mxu0 %v2227_v1  ;;  %s2386_s27 = scalar_select %p534_p11, %s2217_s21, 1  ;;  %v2087_v3 = vld [vmem:[%s2705_s4] sm:$0xff]   ;;  %v2086_v7 = vld [vmem:[%s2706_s2 + $0x8] sm:$0xff]  }
  0x20   : > { %v2085_v4 = vld [vmem:[%s2706_s2] sm:$0xff]   ;;  %1896 = vmatpush3.bf16.msra.mxu1 %v2087_v3  ;;  %v2088_v8 = vld [vmem:[%s2705_s4 + $0x8] sm:$0xff]  }
  0x21   : > { %s1794_s25 = sshll.u32 %s2386_s27, 3  ;;  %1897 = vmatprep.subr.bf16.mxu1 %v2227_v1  ;;  %s1795_s29 = sshll.u32 %s2386_s27, 2 }
  0x22   : > { %1890 = vmatpush3.bf16.msra.mxu0 %v2084_v2  ;;  %s537_s16 = scalar_lea.vmem %s2707_s0, %s1794_s25  ;;  %s2231_s25 = smov 104  }
  0x23   : > { %1903 = vmatprep.subr.bf16.mxu0 %v2227_v1  ;;  %v2399_v5 = vld [vmem:[%s537_s16] sm:$0xff]  ;;  %s2229_s16 = smov 120   ;;  %s544_s22 = scalar_lea.vmem %s2708_s1, %s1795_s29 }
  0x24   : > { %v551_v6 = vpack.c.bf16 %v2399_v5, %v2399_v5  ;;  %1898 = vmatpush3.bf16.msra.mxu1 %v2088_v8  ;;  %v773_v43 = vld [vmem:[%s544_s22] sm:$0xf]  ;;  %s2477_s27 = sand.u32 1, %s2209_s19   ;;  %s2119_s1 = sshll.u32 %s2232_s17, 4  ;;  %s2120_s1 = int_to_ptr.vmem [resolvable:$false] %s2119_s1 }
  0x25   : > { %1911 = vmatprep.subr.bf16.mxu1 %v2227_v1  ;;  %v774_v44 = vunpack.c.l.bf16 %v773_v43  ;;  %s1793_s26 = sshll.u32 %s2477_s27, 5 }
  0x26   : > { %1892 = vmatmul.mubr.msk.bf16.vlgmr.msra.gmra.mrb[0].mxu0 %vm568_vm1, %v551_v6  ;;  %s2480_s29 = scalar_lea.vmem [#allocation6], %s1793_s26  ;;  %s1845_s26 = sshll.u32 %s2217_s21, 9 }
  0x27   : > { %1904 = vmatpush3.bf16.msra.mxu0 %v2085_v4  ;;  %1907 = vmatprep.mubr.msk.bf16.mxu0 %vm2228_vm0, %v2227_v1  ;;  %s1665_s22 = sshll.u32 %s2480_s29, 4  ;;  %s2590_s0 = scalar_lea.hbm %s2691_s15, %s1845_s26  ;;  %s2585_s22 = int_to_ptr.vmem [resolvable:$true] %s1665_s22 }
  0x28   : > { %1905 = vmatprep.subr.bf16.mxu0 %v2227_v1  ;;  %1900 = vmatmul.mubr.msk.bf16.vlgmr.msra.gmra.mrb[0].mxu1 %vm568_vm1, %v551_v6  ;;  %s2115_s3 = scalar_lea.vmem %s2585_s22, 512  ;;  %p2122_p1 = scmp.lt.s32.totalorder %s2585_s22, %s2120_s1 }
  0x29   : > { %1913 = vmatprep.mubr.msk.bf16.mxu1 %vm2228_vm0, %v2227_v1  ;;  %p2116_p12 = scmp.ne.s32.totalorder %s2585_s22, %s2115_s3 }
  0x2b   : > { %1906 = vmatpush3.bf16.msra.mxu0 %v2086_v7  ;;  %p2117_p13 = pnand %p2116_p12, %p2356_p4 }
  0x2c   : > { %1917 = vmatprep.subr.bf16.mxu0 %v2227_v1 }
  0x2d   : > { %p2118_p0 = pneg %p2117_p13 }
  0x2e   : > { %1908 = vmatmul.mubr.msk.bf16.vlgmr.msra.gmra.mrb[4].mxu0 %vm568_vm1, %v551_v6 }
  0x2f   : > { %1919 = vmatprep.mubr.msk.bf16.mxu0 %vm2228_vm0, %v2227_v1 }
  0xf9   : > { %v606_v9 = vpop.f32.mrb[0].mxu0 }
  0xfa   : > { %v668_v10 = vpack.c.bf16 %v606_v9, %v606_v9  ;;  %v1893_v11 = vpop.f32.mrb[1].mxu0 }
  0xfb   : > { %v609_v12 = vpop.f32.mrb[2].mxu0  ;;  %v662_v21 = vpop.f32.mrb[0].mxu1 }
  0xfc   : > { %670 = vst.msk [vmem:[#allocation2] sm:$0xf] %vm669_vm2, %v668_v10  ;;  %676 = vrot.lane.b32.xlu0 %v668_v10, %s2229_s16  ;;  %v1894_v13 = vpop.f32.mrb[3].mxu0  ;;  %v2434_v22 = vpack.c.bf16 %v662_v21, %v662_v21  ;;  %v1901_v23 = vpop.f32.mrb[1].mxu1 }
  0xfd   : > { %v665_v24 = vpop.f32.mrb[2].mxu1 }
  0xfe   : > { %672 = vst.msk [vmem:[#allocation3] sm:$0xf] %vm669_vm2, %v2434_v22  ;;  %v1902_v25 = vpop.f32.mrb[3].mxu1 }
 0x100   : > { %689 = vrot.lane.b32.xlu0 %v668_v10, %s2230_s24 }
 0x101   : > { %v767_v14 = vpop.f32.mrb[4].mxu0 }
 0x102   : > { %776 = vrot.lane.b32.xlu1 %v767_v14, %s2229_s16  ;;  %v1909_v15 = vpop.f32.mrb[5].mxu0  ;;  %v785_v20 = vpack.c.bf16 %v767_v14, %v767_v14 }
 0x103   : > { %v770_v16 = vpop.f32.mrb[6].mxu0  ;;  %v789_v17 = vld [vmem:[#allocation2] sm:$0xf] }
 0x104   : > { %779 = vrot.lane.b32.xlu0 %v767_v14, %s2230_s24  ;;  %v1910_v18 = vpop.f32.mrb[7].mxu0  ;;  %v802_v19 = vsel %vm797_vm3, %v789_v17, 0 }
 0x105   : > { %1912 = vmatpush3.bf16.xpose.msra.mxu1 %v802_v19  ;;  %v793_v36 = vld [vmem:[#allocation3] sm:$0xf] }
 0x106   : > { %699 = vrot.lane.b32.xlu1 %v668_v10, %s2231_s25  ;;  %1923 = vmatprep.subr.bf16.mxu1 %v2227_v1  ;;  %v1039_v40 = vsel %vm1037_vm4, %v793_v36, 0 }
 0x10a   : > { %782 = vrot.lane.b32.xlu1 %v767_v14, %s2231_s25 }
 0x10c   : > { %1914 = vmatmul.mubr.msk.bf16.vlgmr.msra.gmra.mrb[4].mxu1 %vm797_vm3, %v785_v20 }
 0x10d   : > { %1925 = vmatprep.mubr.msk.bf16.mxu1 %vm2228_vm0, %v2227_v1 }
 0x16e   : > { %v677_v26 = vpop.permute.xlu0 %676 }
 0x16f   : > { %680 = vst.msk [vmem:[#allocation2 + $0x4] sm:$0xf] %vm669_vm2, %v677_v26 }
 0x172   : > { %v690_v27 = vpop.permute.xlu0 %689 }
 0x173   : > { %693 = vst.msk [vmem:[#allocation2 + $0x8] sm:$0xf] %vm669_vm2, %v690_v27 }
 0x174   : > { %v777_v28 = vpop.permute.xlu1 %776 }
 0x175   : > { %v786_v34 = vpack.c.bf16 %v777_v28, %v777_v28 }
 0x176   : > { %v790_v29 = vld [vmem:[#allocation2 + $0x4] sm:$0xf]  ;;  %v780_v35 = vpop.permute.xlu0 %779 }
 0x177   : > { %v848_v30 = vsel %vm797_vm3, %v790_v29, 0  ;;  %v787_v38 = vpack.c.bf16 %v780_v35, %v780_v35 }
 0x178   : > { %1918 = vmatpush3.bf16.xpose.msra.mxu0 %v848_v30  ;;  %v700_v31 = vpop.permute.xlu1 %699 }
 0x179   : > { %703 = vst.msk [vmem:[#allocation2 + $0xc] sm:$0xf] %vm669_vm2, %v700_v31  ;;  %1929 = vmatprep.subr.bf16.mxu0 %v2227_v1 }
 0x17a   : > { %v791_v32 = vld [vmem:[#allocation2 + $0x8] sm:$0xf] }
 0x17b   : > { %v894_v33 = vsel %vm797_vm3, %v791_v32, 0 }
 0x17c   : > { %1924 = vmatpush3.bf16.xpose.msra.mxu1 %v894_v33  ;;  %v783_v41 = vpop.permute.xlu1 %782 }
 0x17d   : > { %1935 = vmatprep.subr.bf16.mxu1 %v2227_v1  ;;  %v788_v42 = vpack.c.bf16 %v783_v41, %v783_v41 }
 0x17f   : > { %1920 = vmatmul.mubr.msk.bf16.vlgmr.msra.gmra.mrb[8].mxu0 %vm797_vm3, %v786_v34 }
 0x180   : > { %v792_v37 = vld [vmem:[#allocation2 + $0xc] sm:$0xf]  ;;  %1931 = vmatprep.mubr.msk.bf16.mxu0 %vm2228_vm0, %v2227_v1 }
 0x181   : > { %v940_v39 = vsel %vm797_vm3, %v792_v37, 0 }
 0x182   : > { %1930 = vmatpush3.bf16.xpose.msra.mxu0 %v940_v39 }
 0x183   : > { %1926 = vmatmul.mubr.msk.bf16.vlgmr.msra.gmra.mrb[8].mxu1 %vm797_vm3, %v787_v38  ;;  %1941 = vmatprep.subr.bf16.mxu0 %v2227_v1 }
 0x184   : > { %1936 = vmatpush3.bf16.msra.mxu1 %v1039_v40  ;;  %1937 = vmatprep.mubr.msk.bf16.mxu1 %vm2228_vm0, %v2227_v1 }
 0x185   : > { %1947 = vmatprep.subr.bf16.mxu1 %v2227_v1 }
 0x189   : > { %1932 = vmatmul.mubr.msk.bf16.vlgmr.msra.gmra.mrb[12].mxu0 %vm797_vm3, %v788_v42 }
 0x18a   : > { %1943 = vmatprep.mubr.msk.bf16.mxu0 %vm2228_vm0, %v2227_v1 }
 0x1df   : > { %v838_v45 = vpop.f32.mrb[4].mxu1 }
 0x1e0   : > { %v839_v46 = vadd.f32 %v838_v45, %v774_v44  ;;  %v1915_v47 = vpop.f32.mrb[5].mxu1 }
 0x1e1   : > { %v841_v48 = vpop.f32.mrb[6].mxu1 }
 0x1e2   : > { %v1916_v49 = vpop.f32.mrb[7].mxu1  ;;  %v982_v50 = vsel %vm797_vm3, %v839_v46, -inf }
 0x1e3   : > { %983 = vmax.xlane.f32.xlu0 %v982_v50  ;;  %v1220_v49 = vld [vmem:[%s2681_s5] sm:$0xf] }
 0x252   : > { %v884_v51 = vpop.f32.mrb[8].mxu0 }
 0x253   : > { %v885_v52 = vadd.f32 %v884_v51, %v774_v44  ;;  %v1921_v53 = vpop.f32.mrb[9].mxu0 }
 0x254   : > { %v887_v54 = vpop.f32.mrb[10].mxu0  ;;  %v1225_v53 = vsel %vm1037_vm4, %v1220_v49, 0 }
 0x255   : > { %v1922_v55 = vpop.f32.mrb[11].mxu0  ;;  %v985_v56 = vsel %vm797_vm3, %v885_v52, -inf  ;;  %v1816_v54 = vld [vmem:[%s2681_s5 + $0x4] sm:$0xf] }
 0x256   : > { %v930_v57 = vpop.f32.mrb[8].mxu1  ;;  %986 = vmax.xlane.f32.xlu1 %v985_v56 }
 0x257   : > { %v931_v58 = vadd.f32 %v930_v57, %v774_v44  ;;  %v1927_v59 = vpop.f32.mrb[9].mxu1 }
 0x258   : > { %v933_v60 = vpop.f32.mrb[10].mxu1 }
 0x259   : > { %v1928_v61 = vpop.f32.mrb[11].mxu1  ;;  %v988_v62 = vsel %vm797_vm3, %v931_v58, -inf }
 0x25a   : > { %989 = vmax.xlane.f32.xlu0 %v988_v62  ;;  %v1818_v61 = vld [vmem:[%s2681_s5 + $0x8] sm:$0xf] }
 0x25c   : > { %v976_v63 = vpop.f32.mrb[12].mxu0 }
 0x25d   : > { %v977_v0 = vadd.f32 %v976_v63, %v774_v44  ;;  %v1933_v2 = vpop.f32.mrb[13].mxu0 }
 0x25e   : > { %v979_v3 = vpop.f32.mrb[14].mxu0  ;;  %v1325_v2 = vsel %vm1037_vm4, %v1818_v61, 0 }
 0x25f   : > { %v1934_v4 = vpop.f32.mrb[15].mxu0  ;;  %v991_v6 = vsel %vm797_vm3, %v977_v0, -inf }
 0x260   : > { %992 = vmax.xlane.f32.xlu0 %v991_v6 }
 0x270   : > { %v984_v7 = vpop.xlane.xlu0 %983 }
 0x271   : > { %v994_v8 = vsub.f32 %v839_v46, %v984_v7 }
 0x273   : > { %v998_v9 = vmul.f32 1.442695, %v994_v8 }
 0x275   : > { %2095 = vpow2.f32 %v998_v9  ;;  %v1820_v9 = vld [vmem:[%s2681_s5 + $0xc] sm:$0xf] }
 0x27f   : > { %v2096_v10 = vpop.eup %2095 }
 0x280   : > { %v1006_v11 = vsel %vm797_vm3, %v2096_v10, 0.0 }
 0x281   : > { %1007 = vadd.xlane.f32.xlu1 %v1006_v11 }
 0x2e3   : > { %v987_v12 = vpop.xlane.xlu1 %986 }
 0x2e4   : > { %v995_v13 = vsub.f32 %v885_v52, %v987_v12 }
 0x2e6   : > { %v1000_v14 = vmul.f32 1.442695, %v995_v13 }
 0x2e7   : > { %v990_v15 = vpop.xlane.xlu0 %989 }
 0x2e8   : > { %2097 = vpow2.f32 %v1000_v14  ;;  %v996_v16 = vsub.f32 %v931_v58, %v990_v15  ;;  %v1275_v58 = vsel %vm1037_vm4, %v1816_v54, 0 }
 0x2ea   : > { %v1002_v17 = vmul.f32 1.442695, %v996_v16  ;;  %v1375_v16 = vsel %vm1037_vm4, %v1820_v9, 0 }
 0x2ec   : > { %2099 = vpow2.f32 %v1002_v17 }
 0x2ed   : > { %v993_v18 = vpop.xlane.xlu0 %992 }
 0x2ee   : > { %v997_v19 = vsub.f32 %v977_v0, %v993_v18 }
 0x2f0   : > { %v1004_v20 = vmul.f32 1.442695, %v997_v19 }
 0x2f2   : > { %v2098_v21 = vpop.eup %2097  ;;  %2101 = vpow2.f32 %v1004_v20 }
 0x2f3   : > { %v1009_v23 = vsel %vm797_vm3, %v2098_v21, 0.0 }
 0x2f4   : > { %1010 = vadd.xlane.f32.xlu0 %v1009_v23 }
 0x2f6   : > { %v2100_v24 = vpop.eup %2099 }
 0x2f7   : > { %v1012_v25 = vsel %vm797_vm3, %v2100_v24, 0.0 }
 0x2f8   : > { %1013 = vadd.xlane.f32.xlu1 %v1012_v25 }
 0x2fc   : > { %v2102_v26 = vpop.eup %2101 }
 0x2fd   : > { %v1015_v27 = vsel %vm797_vm3, %v2102_v26, 0.0 }
 0x2fe   : > { %1016 = vadd.xlane.f32.xlu1 %v1015_v27 }
 0x30a   : > { %684 = vrot.lane.b32.xlu0 %v2434_v22, %s2229_s16 }
 0x30e   : > { %v1008_v28 = vpop.xlane.xlu1 %1007  ;;  %704 = vrot.lane.b32.xlu0 %v2434_v22, %s2231_s25 }
 0x30f   : > { %2103 = vrcp.f32 %v1008_v28  ;;  %694 = vrot.lane.b32.xlu1 %v2434_v22, %s2230_s24 }
 0x319   : > { %v2104_v29 = vpop.eup %2103 }
 0x31a   : > { %v1022_v30 = vmul.f32 %v2104_v29, %v2096_v10 }
 0x31c   : > { %v1030_v31 = vpack.c.bf16 %v1022_v30, %v1022_v30  ;;  %1026 = vst.msk [vmem:[%s2480_s29] sm:$0xff] %vm797_vm3, %v1022_v30  ;;  %v2089_v30 = vld [vmem:[%s2684_s8] sm:$0xff]  }
 0x31e   : > { %1938 = vmatmul.mubr.msk.bf16.vlgmr.msra.gmra.mrb[12].mxu1 %vm797_vm3, %v1030_v31 }
 0x31f   : > { %1949 = vmatprep.mubr.msk.bf16.mxu1 %vm2228_vm0, %v2227_v1 }
 0x381   : > { %v1011_v32 = vpop.xlane.xlu0 %1010 }
 0x382   : > { %2105 = vrcp.f32 %v1011_v32 }
 0x385   : > { %v1014_v22 = vpop.xlane.xlu1 %1013  ;;  %v685_v33 = vpop.permute.xlu0 %684 }
 0x386   : > { %2107 = vrcp.f32 %v1014_v22  ;;  %688 = vst.msk [vmem:[#allocation3 + $0x4] sm:$0xf] %vm669_vm2, %v685_v33 }
 0x389   : > { %v705_v34 = vpop.permute.xlu0 %704 }
 0x38a   : > { %708 = vst.msk [vmem:[#allocation3 + $0xc] sm:$0xf] %vm669_vm2, %v705_v34  ;;  %v1822_v34 = vld [vmem:[%s2682_s6] ss:$0 sm:$0xff] }
 0x38b   : > { %v1017_v35 = vpop.xlane.xlu1 %1016 }
 0x38c   : > { %v2106_v36 = vpop.eup %2105  ;;  %2109 = vrcp.f32 %v1017_v35 }
 0x38d   : > { %v1023_v37 = vmul.f32 %v2106_v36, %v2098_v21  ;;  %v794_v38 = vld [vmem:[#allocation3 + $0x4] sm:$0xf]  ;;  %v1823_v36 = vld [vmem:[%s2683_s7] ss:$0 sm:$0xff] }
 0x38e   : > { %v1085_v39 = vsel %vm1037_vm4, %v794_v38, 0 }
 0x38f   : > { %v695_v40 = vpop.permute.xlu1 %694  ;;  %1942 = vmatpush3.bf16.msra.mxu0 %v1085_v39  ;;  %v1031_v41 = vpack.c.bf16 %v1023_v37, %v1023_v37  ;;  %1027 = vst.msk [vmem:[%s2480_s29 + $0x8] sm:$0xff] %vm797_vm3, %v1023_v37  ;;  %v2091_v39 = vld [vmem:[%s2686_s10] sm:$0xff]  }
 0x390   : > { %v2108_v42 = vpop.eup %2107  ;;  %698 = vst.msk [vmem:[#allocation3 + $0x8] sm:$0xf] %vm669_vm2, %v695_v40  ;;  %1953 = vmatprep.subr.bf16.mxu0 %v2227_v1 }
 0x391   : > { %v1024_v43 = vmul.f32 %v2108_v42, %v2100_v24  ;;  %v796_v44 = vld [vmem:[#allocation3 + $0xc] sm:$0xf]  ;;  %v2093_v42 = vld [vmem:[%s2686_s10 + $0x10] sm:$0xff]  }
 0x392   : > { %1944 = vmatmul.mubr.msk.bf16.vlgmr.msra.gmra.mrb[16].mxu0 %vm797_vm3, %v1031_v41  ;;  %v1177_v45 = vsel %vm1037_vm4, %v796_v44, 0  ;;  %v2092_v41 = vld [vmem:[%s2686_s10 + $0x8] sm:$0xff]   ;;  %v1824_v44 = vld [vmem:[%s2685_s9] ss:$0 sm:$0xff] }
 0x393   : > { %1954 = vmatpush3.bf16.msra.mxu0 %v1177_v45  ;;  %1955 = vmatprep.mubr.msk.bf16.mxu0 %vm2228_vm0, %v2227_v1  ;;  %1028 = vst.msk [vmem:[%s2480_s29 + $0x10] sm:$0xff] %vm797_vm3, %v1024_v43  ;;  %v1032_v52 = vpack.c.bf16 %v1024_v43, %v1024_v43  ;;  %v2094_v43 = vld [vmem:[%s2686_s10 + $0x18] sm:$0xff]  }
 0x394   : > { %1983 = vmatprep.subr.bf16.mxu0 %v2227_v1 }
 0x396   : > { %v2110_v46 = vpop.eup %2109 }
 0x397   : > { %v1025_v47 = vmul.f32 %v2110_v46, %v2102_v26  ;;  %v795_v48 = vld [vmem:[#allocation3 + $0x8] sm:$0xf] }
 0x398   : > { %v1131_v50 = vsel %vm1037_vm4, %v795_v48, 0 }
 0x399   : > { %1948 = vmatpush3.bf16.msra.mxu1 %v1131_v50  ;;  %v1033_v51 = vpack.c.bf16 %v1025_v47, %v1025_v47  ;;  %1029 = vst.msk [vmem:[%s2480_s29 + $0x18] sm:$0xff] %vm797_vm3, %v1025_v47  ;;  %s2121_s29 = scalar_lea.vmem %s2120_s1, 1024 }
 0x39a   : > { %1959 = vmatprep.subr.bf16.mxu1 %v2227_v1  ;;  %p2123_p2 = scmp.lt.s32.totalorder %s2121_s29, %s2115_s3 }
 0x39b   : > { %1956 = vmatmul.mubr.msk.bf16.vlgmr.msra.gmra.mrb[20].mxu0 %vm797_vm3, %v1033_v51 }
 0x39c   : > { %1950 = vmatmul.mubr.msk.bf16.vlgmr.msra.gmra.mrb[16].mxu1 %vm797_vm3, %v1032_v52  ;;  %1987 = vmatprep.mubr.msk.bf16.mxu0 %vm2228_vm0, %v2227_v1  ;;  %p2124_p3 = por %p2123_p2, %p2122_p1 }
 0x39d   : > { %1960 = vmatpush3.bf16.msra.mxu1 %v1225_v53  ;;  %1961 = vmatprep.mubr.msk.bf16.mxu1 %vm2228_vm0, %v2227_v1 }
 0x39e   : > { %1965 = vmatprep.subr.bf16.mxu1 %v2227_v1  ;;  %1984 = vmatpush3.bf16.msra.mxu0 %v2089_v30  ;;  %p2125_p5 = pnand %p2124_p3, %p2118_p0 }
 0x39f   : > { %1985 = vmatprep.subr.bf16.mxu0 %v2227_v1 }
 0x3f1   : > { %v1075_v55 = vpop.f32.mrb[12].mxu1 }
 0x3f2   : > { %v1219_v56 = vpack.c.bf16 %v1075_v55, %v1075_v55  ;;  %v1939_v57 = vpop.f32.mrb[13].mxu1 }
 0x3f3   : > { %v1078_v59 = vpop.f32.mrb[14].mxu1 }
 0x3f4   : > { %v1940_v60 = vpop.f32.mrb[15].mxu1  ;;  %1962 = vmatmul.mubr.msk.bf16.vlgmr.msra.gmra.mrb[20].mxu1 %vm797_vm3, %v1219_v56 }
 0x3f5   : > { %1966 = vmatpush3.bf16.msra.mxu1 %v1275_v58  ;;  %1967 = vmatprep.mubr.msk.bf16.mxu1 %vm2228_vm0, %v2227_v1 }
 0x3f6   : > { %1971 = vmatprep.subr.bf16.mxu1 %v2227_v1 }
 0x465   : > { %v1121_v62 = vpop.f32.mrb[16].mxu0 }
 0x466   : > { %v1268_v63 = vpack.c.bf16 %v1121_v62, %v1121_v62  ;;  %v1945_v0 = vpop.f32.mrb[17].mxu0 }
 0x467   : > { %v1124_v3 = vpop.f32.mrb[18].mxu0 }
 0x468   : > { %v1946_v4 = vpop.f32.mrb[19].mxu0  ;;  %1968 = vmatmul.mubr.msk.bf16.vlgmr.msra.gmra.mrb[20].mxu1 %vm797_vm3, %v1268_v63 }
 0x469   : > { %1972 = vmatpush3.bf16.msra.mxu1 %v1325_v2  ;;  %1973 = vmatprep.mubr.msk.bf16.mxu1 %vm2228_vm0, %v2227_v1 }
 0x46a   : > { %1977 = vmatprep.subr.bf16.mxu1 %v2227_v1 }
 0x46e   : > { %v1213_v6 = vpop.f32.mrb[20].mxu0 }
 0x46f   : > { %v1167_v7 = vpop.f32.mrb[16].mxu1  ;;  %v1957_v8 = vpop.f32.mrb[21].mxu0  ;;  %v1368_v17 = vpack.c.bf16 %v1213_v6, %v1213_v6 }
 0x470   : > { %v1951_v10 = vpop.f32.mrb[17].mxu1  ;;  %v1216_v11 = vpop.f32.mrb[22].mxu0  ;;  %v1318_v14 = vpack.c.bf16 %v1167_v7, %v1167_v7 }
 0x471   : > { %v1170_v12 = vpop.f32.mrb[18].mxu1  ;;  %v1958_v13 = vpop.f32.mrb[23].mxu0 }
 0x472   : > { %v1952_v15 = vpop.f32.mrb[19].mxu1 }
 0x474   : > { %1974 = vmatmul.mubr.msk.bf16.vlgmr.msra.gmra.mrb[20].mxu1 %vm797_vm3, %v1318_v14 }
 0x475   : > { %1978 = vmatpush3.bf16.msra.mxu1 %v1375_v16  ;;  %1979 = vmatprep.mubr.msk.bf16.mxu1 %vm2228_vm0, %v2227_v1 }
 0x480   : > { %1980 = vmatmul.mubr.msk.bf16.vlgmr.msra.gmra.mrb[20].mxu1 %vm797_vm3, %v1368_v17 }
 0x553   : > { %v1411_v18 = vpop.f32.mrb[20].mxu1 }
 0x554   : > { %v2003_v19 = vadd.f32 %v1411_v18, %v2399_v5  ;;  %v1981_v20 = vpop.f32.mrb[21].mxu1  ;;  %v2090_v5 = vld [vmem:[%s2684_s8 + $0x8] sm:$0xff]  }
 0x555   : > { %v1414_v21 = vpop.f32.mrb[22].mxu1  ;;  %1986 = vmatpush3.bf16.msra.mxu0 %v2090_v5 }
 0x556   : > { %v1982_v23 = vpop.f32.mrb[23].mxu1  ;;  %v1418_v24 = vsel %vm568_vm1, %v2003_v19, 0.0  ;;  %1991 = vmatprep.subr.bf16.mxu0 %v2227_v1 }
 0x557   : > { %1419 = vadd.xlane.f32.xlu1 %v1418_v24 }
 0x5e4   : > { %v1420_v25 = vpop.xlane.xlu1 %1419 }
 0x5e5   : > { %v1422_v26 = vmul.f32 0.03125, %v1420_v25 }
 0x5e7   : > { %v1423_v27 = vsub.f32 %v2003_v19, %v1422_v26 }
 0x5e9   : > { %v1424_v28 = vmul.f32 %v1423_v27, %v1423_v27 }
 0x5eb   : > { %v1425_v29 = vsel %vm568_vm1, %v1424_v28, 0.0 }
 0x5ec   : > { %1426 = vadd.xlane.f32.xlu0 %v1425_v29 }
 0x679   : > { %v1427_v31 = vpop.xlane.xlu0 %1426 }
 0x67a   : > { %v1428_v32 = vmul.f32 0.03125, %v1427_v31 }
 0x67c   : > { %v1429_v22 = vadd.f32 1e-06, %v1428_v32 }
 0x67e   : > { %2111 = vrsqrt.f32 %v1429_v22 }
 0x688   : > { %v2112_v33 = vpop.eup %2111 }
 0x689   : > { %v1431_v35 = vmul.f32 %v2112_v33, %v1423_v27 }
 0x68b   : > { %v1439_v37 = vmul.f32 %v1822_v34, %v1431_v35 }
 0x68d   : > { %v1447_v38 = vadd.f32 %v1823_v36, %v1439_v37 }
 0x68f   : > { %v1448_v40 = vpack.c.bf16 %v1447_v38, %v1447_v38 }
 0x691   : > { %1988 = vmatmul.mubr.msk.bf16.vlgmr.msra.gmra.mrb[24].mxu0 %vm568_vm1, %v1448_v40 }
 0x692   : > { %1992 = vmatpush3.bf16.msra.mxu0 %v2091_v39  ;;  %1999 = vmatprep.mubr.msk.bf16.mxu0 %vm2228_vm0, %v2227_v1 }
 0x693   : > { %1993 = vmatprep.subr.bf16.mxu0 %v2227_v1 }
 0x696   : > { %1994 = vmatpush3.bf16.msra.mxu0 %v2092_v41 }
 0x697   : > { %1995 = vmatprep.subr.bf16.mxu0 %v2227_v1 }
 0x69a   : > { %1996 = vmatpush3.bf16.msra.mxu0 %v2093_v42 }
 0x69b   : > { %1997 = vmatprep.subr.bf16.mxu0 %v2227_v1  ;;  %v1828_v1 = vld [vmem:[%s2687_s11] ss:$0 sm:$0xff] }
 0x69e   : > { %1998 = vmatpush3.bf16.msra.mxu0 %v2094_v43 }
 0x764   : > { %v1509_v45 = vpop.f32.mrb[24].mxu0 }
 0x765   : > { %v1510_v46 = vadd.f32 %v1824_v44, %v1509_v45  ;;  %v1989_v47 = vpop.f32.mrb[25].mxu0 }
 0x766   : > { %v1512_v48 = vpop.f32.mrb[26].mxu0 }
 0x767   : > { %v1515_v49 = vmax.f32 %v1510_v46, 0.0  ;;  %v1990_v50 = vpop.f32.mrb[27].mxu0 }
 0x769   : > { %v1516_v51 = vpack.c.bf16 %v1515_v49, %v1515_v49 }
 0x76b   : > { %2000 = vmatmul.mubr.msk.bf16.vlgmr.msra.gmra.mrb[28].mxu0 %vm1556_vm5, %v1516_v51 }
 0x83e   : > { %v1594_v52 = vpop.f32.mrb[28].mxu0 }
 0x83f   : > { %v1595_v53 = vadd.f32 %v1828_v1, %v1594_v52  ;;  %v2001_v54 = vpop.f32.mrb[29].mxu0 }
 0x840   : > { %v1597_v55 = vpop.f32.mrb[30].mxu0 }
 0x841   : > { %v2002_v56 = vpop.f32.mrb[31].mxu0  ;;  %v1600_v57 = vadd.f32 %v1595_v53, %v1447_v38 }
 0x843   : > { %v1601_v58 = vsel %vm568_vm1, %v1600_v57, 0.0 }
 0x844   : > { %1602 = vadd.xlane.f32.xlu0 %v1601_v58 }
 0x8d1   : > { %v1603_v59 = vpop.xlane.xlu0 %1602 }
 0x8d2   : > { %v1604_v60 = vmul.f32 0.03125, %v1603_v59 }
 0x8d4   : > { %v1605_v61 = vsub.f32 %v1600_v57, %v1604_v60 }
 0x8d6   : > { %v1606_v62 = vmul.f32 %v1605_v61, %v1605_v61 }
 0x8d8   : > { %v1607_v63 = vsel %vm568_vm1, %v1606_v62, 0.0 }
 0x8d9   : > { %1608 = vadd.xlane.f32.xlu1 %v1607_v63 }
 0x8da   : > { %2128 = shalt.err (!%p2125_p5)
}
 0x8db   : > { %s2129_s26 = scalar_lea.hbm %s2590_s0, 512  ;;  %s2133_s17 = scalar_lea.hbm %s2691_s15, 1024 }
 0x8dc   : > { %p2130_p6 = scmp.ne.s32.totalorder %s2590_s0, %s2129_s26  ;;  %p2134_p10 = scmp.lt.u32.totalorder %s2590_s0, %s2691_s15 }
 0x8dd   : > { %p2135_p11 = scmp.lt.u32.totalorder %s2133_s17, %s2129_s26  ;;  %p2137_p13 = scmp.lt.u32.totalorder %s2129_s26, %s2590_s0 }
 0x8de   : > { %p2131_p7 = pnand %p2130_p6, %p2356_p4 }
 0x8df   : > { %p2136_p12 = por %p2135_p11, %p2134_p10 }
 0x8e0   : > { %p2132_p9 = pneg %p2131_p7 }
 0x8e1   : > { %p2138_p0 = por %p2137_p13, %p2136_p12 }
 0x8e3   : > { %p2139_p1 = pnand %p2138_p0, %p2132_p9 }
 0x8e5   : > { %2142 = shalt.err (!%p2139_p1)
}
 0x8e6   : > { %s2233_s3 = smov 128   ;;  %s2234_s29 = smov 8   ;;  %v1834_v6 = vld [vmem:[%s2688_s12] ss:$0 sm:$0xff] }
 0x8e7   : > { %s2709_s16 = scalar_lea.sflag [#allocation7], %s2477_s27  ;;  %s1792_s25 = sshll.u32 %s2477_s27, 3  ;;  %v1835_v8 = vld [vmem:[%s2689_s13] ss:$0 sm:$0xff] }
 0x8e8   : > { %2017 = dma.vmem_to_hbm [thread:$0]  (%p2356_p4), %s2585_s22, 512, %s2590_s0, %s2709_s16, %s2233_s3, %s2233_s3, %s2234_s29  }
 0x8e9   : > { %s1838_s2 = sshll.u32 %s2217_s21, 7  ;;  %s526_s4 = scalar_lea.vmem [#allocation4], %s1792_s25 }
 0x8ea   : > { %s1651_s22 = sshll.u32 %s526_s4, 4  ;;  %s2627_s29 = scalar_lea.hbm %s2690_s14, %s1838_s2  ;;  %s2629_s22 = int_to_ptr.vmem [resolvable:$true] %s1651_s22 }
 0x8eb   : > { %s1632_s16 = scalar_lea.sflag [#allocation5], %s2477_s27  ;;  %s2143_s26 = scalar_lea.vmem %s2629_s22, 128 }
 0x8ec   : > { %p2144_p2 = scmp.ne.s32.totalorder %s2629_s22, %s2143_s26  ;;  %s2235_s21 = smov [#allocation4]  }
 0x8ed   : > { %s2147_s25 = sshll.u32 %s2235_s21, 4  ;;  %s2148_s25 = int_to_ptr.vmem [resolvable:$false] %s2147_s25 }
 0x8ee   : > { %p2145_p3 = pnand %p2144_p2, %p2356_p4  ;;  %s2149_s24 = scalar_lea.vmem %s2148_s25, 256 }
 0x8ef   : > { %p2150_p6 = scmp.lt.s32.totalorder %s2629_s22, %s2148_s25  ;;  %p2151_p7 = scmp.lt.s32.totalorder %s2149_s24, %s2143_s26 }
 0x8f0   : > { %p2146_p5 = pneg %p2145_p3 }
 0x8f1   : > { %p2152_p9 = por %p2151_p7, %p2150_p6 }
 0x8f3   : > { %p2153_p10 = pnand %p2152_p9, %p2146_p5 }
 0x966   : > { %v1609_v0 = vpop.xlane.xlu1 %1608 }
 0x967   : > { %v1610_v2 = vmul.f32 0.03125, %v1609_v0 }
 0x969   : > { %v1611_v3 = vadd.f32 1e-06, %v1610_v2 }
 0x96b   : > { %2113 = vrsqrt.f32 %v1611_v3 }
 0x975   : > { %v2114_v4 = vpop.eup %2113 }
 0x976   : > { %v1613_v7 = vmul.f32 %v2114_v4, %v1605_v61 }
 0x978   : > { %v1621_v9 = vmul.f32 %v1834_v6, %v1613_v7 }
 0x97a   : > { %v1629_v10 = vadd.f32 %v1835_v8, %v1621_v9 }
 0x97c   : > { %1630 = vst.msk [vmem:[%s526_s4] sm:$0xff] %vm568_vm1, %v1629_v10 }
 0x97d   : > { %2156 = shalt.err (!%p2153_p10)
}
 0x97e   : > { %s2157_s2 = scalar_lea.hbm %s2627_s29, 128  ;;  %s2161_s17 = scalar_lea.hbm %s2690_s14, 256 }
 0x97f   : > { %p2158_p11 = scmp.ne.s32.totalorder %s2627_s29, %s2157_s2  ;;  %p2162_p0 = scmp.lt.u32.totalorder %s2627_s29, %s2690_s14 }
 0x980   : > { %p2163_p1 = scmp.lt.u32.totalorder %s2161_s17, %s2157_s2  ;;  %p2165_p3 = scmp.lt.u32.totalorder %s2157_s2, %s2627_s29 }
 0x981   : > { %p2159_p12 = pnand %p2158_p11, %p2356_p4 }
 0x982   : > { %p2164_p2 = por %p2163_p1, %p2162_p0 }
 0x983   : > { %p2160_p13 = pneg %p2159_p12 }
 0x984   : > { %p2166_p5 = por %p2165_p3, %p2164_p2 }
 0x986   : > { %p2167_p6 = pnand %p2166_p5, %p2160_p13 }
 0x988   : > { %2170 = shalt.err (!%p2167_p6)
}
 0x989   : > { %2016 = dma.vmem_to_hbm [thread:$0]  (%p2356_p4), %s2629_s22, 128, %s2627_s29, %s1632_s16  }
 0x98a PF: > { %p2027_p7 = scmp.ge.s32.totalorder %s2225_s23, 2  ;;  %s1680_s3 = sand.u32 1, %s2205_s18  }
 0x98b   : > { %s1681_s26 = scalar_lea.sflag [#allocation5], %s1680_s3 }
 0x98c   : > { %p2021_p9 = pnand %p2027_p7, %p2363_p8 }
 0x98e   : > { %2196 = dma.done.wait (!%p2021_p9), %s1681_s26, 128  }
 0x98f   : > { %2198 = vsyncadd (!%p2021_p9), %s1681_s26, 4294967168  ;;  %s1690_s21 = scalar_lea.sflag [#allocation7], %s1680_s3 }
 0x990   : > { %2200 = dma.done.wait (!%p2021_p9), %s1690_s21, 512  }
 0x991   : > { %2202 = vsyncadd (!%p2021_p9), %s1690_s21, 4294966784  ;;  %s32_s23 = sadd.s32 1, %s2225_s23   ;;  %s2710_s28 = sld [smem:[#allocation12_spill]] }
 0x992   : > { %p29_p10 = scmp.ge.s32.totalorder %s32_s23, 4   ;;  %s2711_s21 = sld [smem:[#allocation10_spill]] }
 0x993   : > { %s2712_s22 = sld [smem:[#allocation11_spill]]  ;;  %s2713_s18 = smov %s2209_s19 }
 0x994   : > { %s2714_s19 = smov %s2213_s20  ;;  %31 = sbr.rel (!%p29_p10) target bundleno = 12 (0xc), region = 145 }
 0x997   : > { %s2715_s20 = smov %s2710_s28 }
 0x99b   :  { %1695 = vsyncpa [#allocation5], 1 }
 0x99c   :  { %1697 = vsyncpa [#allocation5 + $0x1], 1 }
 0x99d   :  { %1698 = vsyncpa [#allocation7], 1 }
 0x99e   :  { %1700 = vsyncpa [#allocation7 + $0x1], 1 }

// kernel: _encoder_layer_impl.1
= control target key start
LH: loop header
LB: loop body
LE: loop exit
PB: predicated region body
PF: predicated region fallthrough
CT: control target
= control target key end

     0   :  { %s2676_s0 = inlined_call_operand.vmem [shape: f32[2,8,32], index: 0, kind: input, shape index: {}]   ;;  %s2677_s1 = inlined_call_operand.vmem [shape: bf16[2,8,8], index: 1, kind: input, shape index: {}]   ;;  %s2678_s2 = inlined_call_operand.vmem [shape: bf16[32,32], index: 2, kind: input, shape index: {}]   ;;  %s2679_s3 = inlined_call_operand.vmem [shape: bf16[32,32], index: 3, kind: input, shape index: {}]   ;;  %s2680_s4 = inlined_call_operand.vmem [shape: bf16[32,32], index: 4, kind: input, shape index: {}]   ;;  %s2681_s5 = inlined_call_operand.vmem [shape: bf16[4,8,32], index: 5, kind: input, shape index: {}]   ;;  %s2682_s6 = inlined_call_operand.vmem [shape: f32[1,32], index: 6, kind: input, shape index: {}]   ;;  %s2683_s7 = inlined_call_operand.vmem [shape: f32[1,32], index: 7, kind: input, shape index: {}]   ;;  %s2684_s8 = inlined_call_operand.vmem [shape: bf16[32,64], index: 8, kind: input, shape index: {}]   ;;  %s2685_s9 = inlined_call_operand.vmem [shape: f32[1,64], index: 9, kind: input, shape index: {}]   ;;  %s2686_s10 = inlined_call_operand.vmem [shape: bf16[64,32], index: 10, kind: input, shape index: {}]   ;;  %s2687_s11 = inlined_call_operand.vmem [shape: f32[1,32], index: 11, kind: input, shape index: {}]   ;;  %s2688_s12 = inlined_call_operand.vmem [shape: f32[1,32], index: 12, kind: input, shape index: {}]   ;;  %s2689_s13 = inlined_call_operand.vmem [shape: f32[1,32], index: 13, kind: input, shape index: {}]   ;;  %s2690_s14 = inlined_call_operand.hbm [shape: f32[2,8,32], index: 14, kind: output, shape index: {0}]   ;;  %s2691_s15 = inlined_call_operand.hbm [shape: f32[2,4,8,8], index: 15, kind: output, shape index: {1}]  }
   0x1   :  { %2694 = sst [smem:[#allocation13_spill]] %s2676_s0 }
   0x2   :  { %2695 = sst [smem:[#allocation14_spill]] %s2677_s1 }
   0x3   :  { %2696 = sst [smem:[#allocation15_spill]] %s2678_s2 }
   0x4   :  { %2697 = sst [smem:[#allocation16_spill]] %s2679_s3 }
   0x5   :  { %2698 = sst [smem:[#allocation17_spill]] %s2680_s4 }
   0x6   :  { %21 = vsyncpa [#allocation5], 0 }
   0x7   :  { %23 = vsyncpa [#allocation5 + $0x1], 0 }
   0x8   :  { %24 = vsyncpa [#allocation7], 0 }
   0x9   :  { %26 = vsyncpa [#allocation7 + $0x1], 0  ;;  %s2316_s18 = smov 0   ;;  %s2318_s19 = smov 0  }
   0xa   :  { %s2320_s20 = smov 0   ;;  %s2322_s21 = smov 0  }
   0xb   :  { %s2324_s22 = smov 0   ;;  %s2326_s23 = smov 0  }
   0xc LB: > { %2699 = sst [smem:[#allocation10_spill]] %s2221_s22  ;;  %s1787_s24 = sadd.s32 4294967295, %s2225_s23   ;;  %s2225_s23 = sphi %s2326_s23, %s32_s23   ;;  %s2221_s22 = sphi %s2324_s22, %s2712_s22   ;;  %s2217_s21 = sphi %s2322_s21, %s2711_s21   ;;  %s2213_s20 = sphi %s2320_s20, %s2715_s20   ;;  %s2209_s19 = sphi %s2318_s19, %s2714_s19   ;;  %s2205_s18 = sphi %s2316_s18, %s2713_s18  }
   0xd   : > { %s1788_s25 = sadd.s32 4294967294, %s2225_s23   ;;  %s44_s26 = sadd.s32 1, %s2221_s22 }
   0xe   : > { %s359_s27 = sadd.s32 1, %s2213_s20  ;;  %p46_p0 = scmp.ge.s32.totalorder %s44_s26, 2 }
   0xf   : > { %p369_p1 = scmp.ne.s32.totalorder %s2213_s20, %s2209_s19  ;;  %p370_p2 = scmp.eq.s32.totalorder %s1787_s24, 1 }
  0x10   : > { %p375_p3 = scmp.ne.s32.totalorder %s2209_s19, %s2205_s18  ;;  %s2717_s26 = smov (%p46_p0, %s44_s26), 0 }
  0x11   : > { %2700 = sst [smem:[#allocation11_spill]] %s2717_s26  ;;  %p2356_p4 = por %p370_p2, %p369_p1 }
  0x12   : > { %p376_p5 = scmp.eq.s32.totalorder %s1788_s25, 1  ;;  %s354_s29 = ssub.s32 %s2221_s22, %s2717_s26 }
  0x13   : > { %p1791_p6 = scmp.ge.s32.totalorder %s2225_s23, 1  ;;  %p357_p7 = scmp.eq.s32.totalorder %s354_s29, 0 }
  0x14   : > { %p2363_p8 = por %p376_p5, %p375_p3  ;;  %p475_p9 = scmp.lt.s32.totalorder %s2225_s23, 3 }
  0x15   : > { %s2369_s16 = scalar_select %p357_p7, %s2213_s20, %s359_s27  }
  0x16   : > { %p476_p10 = pnand %p1791_p6, %p475_p9 }
  0x17   : > { %2703 = sst [smem:[#allocation12_spill]] %s2369_s16  ;;  %s2704_s3 = sld [smem:[#allocation16_spill]] (!%p476_p10)  ;;  %v2227_v1 = vmov (!%p476_p10), 0.0   ;;  %vm2228_vm0 = vmmov (!%p476_p10), 0   ;;  %vm568_vm1 = vcmask (!%p476_p10), 261120   ;;  %vm669_vm2 = vcmask (!%p476_p10), 60416  }
  0x18   : > { %479 = sbr.rel (%p476_p10) target bundleno = 2442 (0x98a), region = 76  ;;  %1887 = vmatprep.subr.bf16.mxu0 (!%p476_p10), %v2227_v1  ;;  %1895 = vmatprep.subr.bf16.mxu1 (!%p476_p10), %v2227_v1  ;;  %p534_p11 = scmp.lt.s32.totalorder (!%p476_p10), %s2217_s21, 1  ;;  %vm797_vm3 = vcmask (!%p476_p10), 64512   ;;  %vm1037_vm4 = vcmask (!%p476_p10), 1043456   ;;  %vm1556_vm5 = vcmask (!%p476_p10), 523264  }
  0x19   : > { %1891 = vmatprep.mubr.msk.bf16.mxu0 (!%p476_p10), %vm2228_vm0, %v2227_v1  ;;  %1899 = vmatprep.mubr.msk.bf16.mxu1 (!%p476_p10), %vm2228_vm0, %v2227_v1  ;;  %s2705_s4 = sld [smem:[#allocation17_spill]] (!%p476_p10)  ;;  %s2706_s2 = sld [smem:[#allocation15_spill]] (!%p476_p10) }
  0x1a   : > { %s2707_s0 = sld [smem:[#allocation13_spill]] (!%p476_p10)  ;;  %s2230_s24 = smov (!%p476_p10), 112  }
  0x1b   : > { %s2708_s1 = sld [smem:[#allocation14_spill]] (!%p476_p10)  ;;  %s2232_s17 = smov (!%p476_p10), [#allocation6]  }
  0x1d   : > { %v2083_v0 = vld [vmem:[%s2704_s3] sm:$0xff] (!%p476_p10)   ;;  %v2084_v2 = vld [vmem:[%s2704_s3 + $0x8] sm:$0xff] (!%p476_p10)  }
  0x1e   : > { %1888 = vmatpush3.bf16.msra.mxu0 (!%p476_p10), %v2083_v0 }
  0x1f   : > { %1889 = vmatprep.subr.bf16.mxu0 %v2227_v1  ;;  %s2386_s27 = scalar_select %p534_p11, %s2217_s21, 1  ;;  %v2087_v3 = vld [vmem:[%s2705_s4] sm:$0xff]   ;;  %v2086_v7 = vld [vmem:[%s2706_s2 + $0x8] sm:$0xff]  }
  0x20   : > { %v2085_v4 = vld [vmem:[%s2706_s2] sm:$0xff]   ;;  %1896 = vmatpush3.bf16.msra.mxu1 %v2087_v3  ;;  %v2088_v8 = vld [vmem:[%s2705_s4 + $0x8] sm:$0xff]  }
  0x21   : > { %s1794_s25 = sshll.u32 %s2386_s27, 3  ;;  %1897 = vmatprep.subr.bf16.mxu1 %v2227_v1  ;;  %s1795_s29 = sshll.u32 %s2386_s27, 2 }
  0x22   : > { %1890 = vmatpush3.bf16.msra.mxu0 %v2084_v2  ;;  %s537_s16 = scalar_lea.vmem %s2707_s0, %s1794_s25  ;;  %s2231_s25 = smov 104  }
  0x23   : > { %1903 = vmatprep.subr.bf16.mxu0 %v2227_v1  ;;  %v2399_v5 = vld [vmem:[%s537_s16] sm:$0xff]  ;;  %s2229_s16 = smov 120   ;;  %s544_s22 = scalar_lea.vmem %s2708_s1, %s1795_s29 }
  0x24   : > { %v551_v6 = vpack.c.bf16 %v2399_v5, %v2399_v5  ;;  %1898 = vmatpush3.bf16.msra.mxu1 %v2088_v8  ;;  %v773_v43 = vld [vmem:[%s544_s22] sm:$0xf]  ;;  %s2477_s27 = sand.u32 1, %s2209_s19   ;;  %s2119_s1 = sshll.u32 %s2232_s17, 4  ;;  %s2120_s1 = int_to_ptr.vmem [resolvable:$false] %s2119_s1 }
  0x25   : > { %1911 = vmatprep.subr.bf16.mxu1 %v2227_v1  ;;  %v774_v44 = vunpack.c.l.bf16 %v773_v43  ;;  %s1793_s26 = sshll.u32 %s2477_s27, 5 }
  0x26   : > { %1892 = vmatmul.mubr.msk.bf16.vlgmr.msra.gmra.mrb[0].mxu0 %vm568_vm1, %v551_v6  ;;  %s2480_s29 = scalar_lea.vmem [#allocation6], %s1793_s26  ;;  %s1845_s26 = sshll.u32 %s2217_s21, 9 }
  0x27   : > { %1904 = vmatpush3.bf16.msra.mxu0 %v2085_v4  ;;  %1907 = vmatprep.mubr.msk.bf16.mxu0 %vm2228_vm0, %v2227_v1  ;;  %s1665_s22 = sshll.u32 %s2480_s29, 4  ;;  %s2590_s0 = scalar_lea.hbm %s2691_s15, %s1845_s26  ;;  %s2585_s22 = int_to_ptr.vmem [resolvable:$true] %s1665_s22 }
  0x28   : > { %1905 = vmatprep.subr.bf16.mxu0 %v2227_v1  ;;  %1900 = vmatmul.mubr.msk.bf16.vlgmr.msra.gmra.mrb[0].mxu1 %vm568_vm1, %v551_v6  ;;  %s2115_s3 = scalar_lea.vmem %s2585_s22, 512  ;;  %p2122_p1 = scmp.lt.s32.totalorder %s2585_s22, %s2120_s1 }
  0x29   : > { %1913 = vmatprep.mubr.msk.bf16.mxu1 %vm2228_vm0, %v2227_v1  ;;  %p2116_p12 = scmp.ne.s32.totalorder %s2585_s22, %s2115_s3 }
  0x2b   : > { %1906 = vmatpush3.bf16.msra.mxu0 %v2086_v7  ;;  %p2117_p13 = pnand %p2116_p12, %p2356_p4 }
  0x2c   : > { %1917 = vmatprep.subr.bf16.mxu0 %v2227_v1 }
  0x2d   : > { %p2118_p0 = pneg %p2117_p13 }
  0x2e   : > { %1908 = vmatmul.mubr.msk.bf16.vlgmr.msra.gmra.mrb[4].mxu0 %vm568_vm1, %v551_v6 }
  0x2f   : > { %1919 = vmatprep.mubr.msk.bf16.mxu0 %vm2228_vm0, %v2227_v1 }
  0xf9   : > { %v606_v9 = vpop.f32.mrb[0].mxu0 }
  0xfa   : > { %v668_v10 = vpack.c.bf16 %v606_v9, %v606_v9  ;;  %v1893_v11 = vpop.f32.mrb[1].mxu0 }
  0xfb   : > { %v609_v12 = vpop.f32.mrb[2].mxu0  ;;  %v662_v21 = vpop.f32.mrb[0].mxu1 }
  0xfc   : > { %670 = vst.msk [vmem:[#allocation2] sm:$0xf] %vm669_vm2, %v668_v10  ;;  %676 = vrot.lane.b32.xlu0 %v668_v10, %s2229_s16  ;;  %v1894_v13 = vpop.f32.mrb[3].mxu0  ;;  %v2434_v22 = vpack.c.bf16 %v662_v21, %v662_v21  ;;  %v1901_v23 = vpop.f32.mrb[1].mxu1 }
  0xfd   : > { %v665_v24 = vpop.f32.mrb[2].mxu1 }
  0xfe   : > { %672 = vst.msk [vmem:[#allocation3] sm:$0xf] %vm669_vm2, %v2434_v22  ;;  %v1902_v25 = vpop.f32.mrb[3].mxu1 }
 0x100   : > { %689 = vrot.lane.b32.xlu0 %v668_v10, %s2230_s24 }
 0x101   : > { %v767_v14 = vpop.f32.mrb[4].mxu0 }
 0x102   : > { %776 = vrot.lane.b32.xlu1 %v767_v14, %s2229_s16  ;;  %v1909_v15 = vpop.f32.mrb[5].mxu0  ;;  %v785_v20 = vpack.c.bf16 %v767_v14, %v767_v14 }
 0x103   : > { %v770_v16 = vpop.f32.mrb[6].mxu0  ;;  %v789_v17 = vld [vmem:[#allocation2] sm:$0xf] }
 0x104   : > { %779 = vrot.lane.b32.xlu0 %v767_v14, %s2230_s24  ;;  %v1910_v18 = vpop.f32.mrb[7].mxu0  ;;  %v802_v19 = vsel %vm797_vm3, %v789_v17, 0 }
 0x105   : > { %1912 = vmatpush3.bf16.xpose.msra.mxu1 %v802_v19  ;;  %v793_v36 = vld [vmem:[#allocation3] sm:$0xf] }
 0x106   : > { %699 = vrot.lane.b32.xlu1 %v668_v10, %s2231_s25  ;;  %1923 = vmatprep.subr.bf16.mxu1 %v2227_v1  ;;  %v1039_v40 = vsel %vm1037_vm4, %v793_v36, 0 }
 0x10a   : > { %782 = vrot.lane.b32.xlu1 %v767_v14, %s2231_s25 }
 0x10c   : > { %1914 = vmatmul.mubr.msk.bf16.vlgmr.msra.gmra.mrb[4].mxu1 %vm797_vm3, %v785_v20 }
 0x10d   : > { %1925 = vmatprep.mubr.msk.bf16.mxu1 %vm2228_vm0, %v2227_v1 }
 0x16e   : > { %v677_v26 = vpop.permute.xlu0 %676 }
 0x16f   : > { %680 = vst.msk [vmem:[#allocation2 + $0x4] sm:$0xf] %vm669_vm2, %v677_v26 }
 0x172   : > { %v690_v27 = vpop.permute.xlu0 %689 }
 0x173   : > { %693 = vst.msk [vmem:[#allocation2 + $0x8] sm:$0xf] %vm669_vm2, %v690_v27 }
 0x174   : > { %v777_v28 = vpop.permute.xlu1 %776 }
 0x175   : > { %v786_v34 = vpack.c.bf16 %v777_v28, %v777_v28 }
 0x176   : > { %v790_v29 = vld [vmem:[#allocation2 + $0x4] sm:$0xf]  ;;  %v780_v35 = vpop.permute.xlu0 %779 }
 0x177   : > { %v848_v30 = vsel %vm797_vm3, %v790_v29, 0  ;;  %v787_v38 = vpack.c.bf16 %v780_v35, %v780_v35 }
 0x178   : > { %1918 = vmatpush3.bf16.xpose.msra.mxu0 %v848_v30  ;;  %v700_v31 = vpop.permute.xlu1 %699 }
 0x179   : > { %703 = vst.msk [vmem:[#allocation2 + $0xc] sm:$0xf] %vm669_vm2, %v700_v31  ;;  %1929 = vmatprep.subr.bf16.mxu0 %v2227_v1 }
 0x17a   : > { %v791_v32 = vld [vmem:[#allocation2 + $0x8] sm:$0xf] }
 0x17b   : > { %v894_v33 = vsel %vm797_vm3, %v791_v32, 0 }
 0x17c   : > { %1924 = vmatpush3.bf16.xpose.msra.mxu1 %v894_v33  ;;  %v783_v41 = vpop.permute.xlu1 %782 }
 0x17d   : > { %1935 = vmatprep.subr.bf16.mxu1 %v2227_v1  ;;  %v788_v42 = vpack.c.bf16 %v783_v41, %v783_v41 }
 0x17f   : > { %1920 = vmatmul.mubr.msk.bf16.vlgmr.msra.gmra.mrb[8].mxu0 %vm797_vm3, %v786_v34 }
 0x180   : > { %v792_v37 = vld [vmem:[#allocation2 + $0xc] sm:$0xf]  ;;  %1931 = vmatprep.mubr.msk.bf16.mxu0 %vm2228_vm0, %v2227_v1 }
 0x181   : > { %v940_v39 = vsel %vm797_vm3, %v792_v37, 0 }
 0x182   : > { %1930 = vmatpush3.bf16.xpose.msra.mxu0 %v940_v39 }
 0x183   : > { %1926 = vmatmul.mubr.msk.bf16.vlgmr.msra.gmra.mrb[8].mxu1 %vm797_vm3, %v787_v38  ;;  %1941 = vmatprep.subr.bf16.mxu0 %v2227_v1 }
 0x184   : > { %1936 = vmatpush3.bf16.msra.mxu1 %v1039_v40  ;;  %1937 = vmatprep.mubr.msk.bf16.mxu1 %vm2228_vm0, %v2227_v1 }
 0x185   : > { %1947 = vmatprep.subr.bf16.mxu1 %v2227_v1 }
 0x189   : > { %1932 = vmatmul.mubr.msk.bf16.vlgmr.msra.gmra.mrb[12].mxu0 %vm797_vm3, %v788_v42 }
 0x18a   : > { %1943 = vmatprep.mubr.msk.bf16.mxu0 %vm2228_vm0, %v2227_v1 }
 0x1df   : > { %v838_v45 = vpop.f32.mrb[4].mxu1 }
 0x1e0   : > { %v839_v46 = vadd.f32 %v838_v45, %v774_v44  ;;  %v1915_v47 = vpop.f32.mrb[5].mxu1 }
 0x1e1   : > { %v841_v48 = vpop.f32.mrb[6].mxu1 }
 0x1e2   : > { %v1916_v49 = vpop.f32.mrb[7].mxu1  ;;  %v982_v50 = vsel %vm797_vm3, %v839_v46, -inf }
 0x1e3   : > { %983 = vmax.xlane.f32.xlu0 %v982_v50  ;;  %v1220_v49 = vld [vmem:[%s2681_s5] sm:$0xf] }
 0x252   : > { %v884_v51 = vpop.f32.mrb[8].mxu0 }
 0x253   : > { %v885_v52 = vadd.f32 %v884_v51, %v774_v44  ;;  %v1921_v53 = vpop.f32.mrb[9].mxu0 }
 0x254   : > { %v887_v54 = vpop.f32.mrb[10].mxu0  ;;  %v1225_v53 = vsel %vm1037_vm4, %v1220_v49, 0 }
 0x255   : > { %v1922_v55 = vpop.f32.mrb[11].mxu0  ;;  %v985_v56 = vsel %vm797_vm3, %v885_v52, -inf  ;;  %v1816_v54 = vld [vmem:[%s2681_s5 + $0x4] sm:$0xf] }
 0x256   : > { %v930_v57 = vpop.f32.mrb[8].mxu1  ;;  %986 = vmax.xlane.f32.xlu1 %v985_v56 }
 0x257   : > { %v931_v58 = vadd.f32 %v930_v57, %v774_v44  ;;  %v1927_v59 = vpop.f32.mrb[9].mxu1 }
 0x258   : > { %v933_v60 = vpop.f32.mrb[10].mxu1 }
 0x259   : > { %v1928_v61 = vpop.f32.mrb[11].mxu1  ;;  %v988_v62 = vsel %vm797_vm3, %v931_v58, -inf }
 0x25a   : > { %989 = vmax.xlane.f32.xlu0 %v988_v62  ;;  %v1818_v61 = vld [vmem:[%s2681_s5 + $0x8] sm:$0xf] }
 0x25c   : > { %v976_v63 = vpop.f32.mrb[12].mxu0 }
 0x25d   : > { %v977_v0 = vadd.f32 %v976_v63, %v774_v44  ;;  %v1933_v2 = vpop.f32.mrb[13].mxu0 }
 0x25e   : > { %v979_v3 = vpop.f32.mrb[14].mxu0  ;;  %v1325_v2 = vsel %vm1037_vm4, %v1818_v61, 0 }
 0x25f   : > { %v1934_v4 = vpop.f32.mrb[15].mxu0  ;;  %v991_v6 = vsel %vm797_vm3, %v977_v0, -inf }
 0x260   : > { %992 = vmax.xlane.f32.xlu0 %v991_v6 }
 0x270   : > { %v984_v7 = vpop.xlane.xlu0 %983 }
 0x271   : > { %v994_v8 = vsub.f32 %v839_v46, %v984_v7 }
 0x273   : > { %v998_v9 = vmul.f32 1.442695, %v994_v8 }
 0x275   : > { %2095 = vpow2.f32 %v998_v9  ;;  %v1820_v9 = vld [vmem:[%s2681_s5 + $0xc] sm:$0xf] }
 0x27f   : > { %v2096_v10 = vpop.eup %2095 }
 0x280   : > { %v1006_v11 = vsel %vm797_vm3, %v2096_v10, 0.0 }
 0x281   : > { %1007 = vadd.xlane.f32.xlu1 %v1006_v11 }
 0x2e3   : > { %v987_v12 = vpop.xlane.xlu1 %986 }
 0x2e4   : > { %v995_v13 = vsub.f32 %v885_v52, %v987_v12 }
 0x2e6   : > { %v1000_v14 = vmul.f32 1.442695, %v995_v13 }
 0x2e7   : > { %v990_v15 = vpop.xlane.xlu0 %989 }
 0x2e8   : > { %2097 = vpow2.f32 %v1000_v14  ;;  %v996_v16 = vsub.f32 %v931_v58, %v990_v15  ;;  %v1275_v58 = vsel %vm1037_vm4, %v1816_v54, 0 }
 0x2ea   : > { %v1002_v17 = vmul.f32 1.442695, %v996_v16  ;;  %v1375_v16 = vsel %vm1037_vm4, %v1820_v9, 0 }
 0x2ec   : > { %2099 = vpow2.f32 %v1002_v17 }
 0x2ed   : > { %v993_v18 = vpop.xlane.xlu0 %992 }
 0x2ee   : > { %v997_v19 = vsub.f32 %v977_v0, %v993_v18 }
 0x2f0   : > { %v1004_v20 = vmul.f32 1.442695, %v997_v19 }
 0x2f2   : > { %v2098_v21 = vpop.eup %2097  ;;  %2101 = vpow2.f32 %v1004_v20 }
 0x2f3   : > { %v1009_v23 = vsel %vm797_vm3, %v2098_v21, 0.0 }
 0x2f4   : > { %1010 = vadd.xlane.f32.xlu0 %v1009_v23 }
 0x2f6   : > { %v2100_v24 = vpop.eup %2099 }
 0x2f7   : > { %v1012_v25 = vsel %vm797_vm3, %v2100_v24, 0.0 }
 0x2f8   : > { %1013 = vadd.xlane.f32.xlu1 %v1012_v25 }
 0x2fc   : > { %v2102_v26 = vpop.eup %2101 }
 0x2fd   : > { %v1015_v27 = vsel %vm797_vm3, %v2102_v26, 0.0 }
 0x2fe   : > { %1016 = vadd.xlane.f32.xlu1 %v1015_v27 }
 0x30a   : > { %684 = vrot.lane.b32.xlu0 %v2434_v22, %s2229_s16 }
 0x30e   : > { %v1008_v28 = vpop.xlane.xlu1 %1007  ;;  %704 = vrot.lane.b32.xlu0 %v2434_v22, %s2231_s25 }
 0x30f   : > { %2103 = vrcp.f32 %v1008_v28  ;;  %694 = vrot.lane.b32.xlu1 %v2434_v22, %s2230_s24 }
 0x319   : > { %v2104_v29 = vpop.eup %2103 }
 0x31a   : > { %v1022_v30 = vmul.f32 %v2104_v29, %v2096_v10 }
 0x31c   : > { %v1030_v31 = vpack.c.bf16 %v1022_v30, %v1022_v30  ;;  %1026 = vst.msk [vmem:[%s2480_s29] sm:$0xff] %vm797_vm3, %v1022_v30  ;;  %v2089_v30 = vld [vmem:[%s2684_s8] sm:$0xff]  }
 0x31e   : > { %1938 = vmatmul.mubr.msk.bf16.vlgmr.msra.gmra.mrb[12].mxu1 %vm797_vm3, %v1030_v31 }
 0x31f   : > { %1949 = vmatprep.mubr.msk.bf16.mxu1 %vm2228_vm0, %v2227_v1 }
 0x381   : > { %v1011_v32 = vpop.xlane.xlu0 %1010 }
 0x382   : > { %2105 = vrcp.f32 %v1011_v32 }
 0x385   : > { %v1014_v22 = vpop.xlane.xlu1 %1013  ;;  %v685_v33 = vpop.permute.xlu0 %684 }
 0x386   : > { %2107 = vrcp.f32 %v1014_v22  ;;  %688 = vst.msk [vmem:[#allocation3 + $0x4] sm:$0xf] %vm669_vm2, %v685_v33 }
 0x389   : > { %v705_v34 = vpop.permute.xlu0 %704 }
 0x38a   : > { %708 = vst.msk [vmem:[#allocation3 + $0xc] sm:$0xf] %vm669_vm2, %v705_v34  ;;  %v1822_v34 = vld [vmem:[%s2682_s6] ss:$0 sm:$0xff] }
 0x38b   : > { %v1017_v35 = vpop.xlane.xlu1 %1016 }
 0x38c   : > { %v2106_v36 = vpop.eup %2105  ;;  %2109 = vrcp.f32 %v1017_v35 }
 0x38d   : > { %v1023_v37 = vmul.f32 %v2106_v36, %v2098_v21  ;;  %v794_v38 = vld [vmem:[#allocation3 + $0x4] sm:$0xf]  ;;  %v1823_v36 = vld [vmem:[%s2683_s7] ss:$0 sm:$0xff] }
 0x38e   : > { %v1085_v39 = vsel %vm1037_vm4, %v794_v38, 0 }
 0x38f   : > { %v695_v40 = vpop.permute.xlu1 %694  ;;  %1942 = vmatpush3.bf16.msra.mxu0 %v1085_v39  ;;  %v1031_v41 = vpack.c.bf16 %v1023_v37, %v1023_v37  ;;  %1027 = vst.msk [vmem:[%s2480_s29 + $0x8] sm:$0xff] %vm797_vm3, %v1023_v37  ;;  %v2091_v39 = vld [vmem:[%s2686_s10] sm:$0xff]  }
 0x390   : > { %v2108_v42 = vpop.eup %2107  ;;  %698 = vst.msk [vmem:[#allocation3 + $0x8] sm:$0xf] %vm669_vm2, %v695_v40  ;;  %1953 = vmatprep.subr.bf16.mxu0 %v2227_v1 }
 0x391   : > { %v1024_v43 = vmul.f32 %v2108_v42, %v2100_v24  ;;  %v796_v44 = vld [vmem:[#allocation3 + $0xc] sm:$0xf]  ;;  %v2093_v42 = vld [vmem:[%s2686_s10 + $0x10] sm:$0xff]  }
 0x392   : > { %1944 = vmatmul.mubr.msk.bf16.vlgmr.msra.gmra.mrb[16].mxu0 %vm797_vm3, %v1031_v41  ;;  %v1177_v45 = vsel %vm1037_vm4, %v796_v44, 0  ;;  %v2092_v41 = vld [vmem:[%s2686_s10 + $0x8] sm:$0xff]   ;;  %v1824_v44 = vld [vmem:[%s2685_s9] ss:$0 sm:$0xff] }
 0x393   : > { %1954 = vmatpush3.bf16.msra.mxu0 %v1177_v45  ;;  %1955 = vmatprep.mubr.msk.bf16.mxu0 %vm2228_vm0, %v2227_v1  ;;  %1028 = vst.msk [vmem:[%s2480_s29 + $0x10] sm:$0xff] %vm797_vm3, %v1024_v43  ;;  %v1032_v52 = vpack.c.bf16 %v1024_v43, %v1024_v43  ;;  %v2094_v43 = vld [vmem:[%s2686_s10 + $0x18] sm:$0xff]  }
 0x394   : > { %1983 = vmatprep.subr.bf16.mxu0 %v2227_v1 }
 0x396   : > { %v2110_v46 = vpop.eup %2109 }
 0x397   : > { %v1025_v47 = vmul.f32 %v2110_v46, %v2102_v26  ;;  %v795_v48 = vld [vmem:[#allocation3 + $0x8] sm:$0xf] }
 0x398   : > { %v1131_v50 = vsel %vm1037_vm4, %v795_v48, 0 }
 0x399   : > { %1948 = vmatpush3.bf16.msra.mxu1 %v1131_v50  ;;  %v1033_v51 = vpack.c.bf16 %v1025_v47, %v1025_v47  ;;  %1029 = vst.msk [vmem:[%s2480_s29 + $0x18] sm:$0xff] %vm797_vm3, %v1025_v47  ;;  %s2121_s29 = scalar_lea.vmem %s2120_s1, 1024 }
 0x39a   : > { %1959 = vmatprep.subr.bf16.mxu1 %v2227_v1  ;;  %p2123_p2 = scmp.lt.s32.totalorder %s2121_s29, %s2115_s3 }
 0x39b   : > { %1956 = vmatmul.mubr.msk.bf16.vlgmr.msra.gmra.mrb[20].mxu0 %vm797_vm3, %v1033_v51 }
 0x39c   : > { %1950 = vmatmul.mubr.msk.bf16.vlgmr.msra.gmra.mrb[16].mxu1 %vm797_vm3, %v1032_v52  ;;  %1987 = vmatprep.mubr.msk.bf16.mxu0 %vm2228_vm0, %v2227_v1  ;;  %p2124_p3 = por %p2123_p2, %p2122_p1 }
 0x39d   : > { %1960 = vmatpush3.bf16.msra.mxu1 %v1225_v53  ;;  %1961 = vmatprep.mubr.msk.bf16.mxu1 %vm2228_vm0, %v2227_v1 }
 0x39e   : > { %1965 = vmatprep.subr.bf16.mxu1 %v2227_v1  ;;  %1984 = vmatpush3.bf16.msra.mxu0 %v2089_v30  ;;  %p2125_p5 = pnand %p2124_p3, %p2118_p0 }
 0x39f   : > { %1985 = vmatprep.subr.bf16.mxu0 %v2227_v1 }
 0x3f1   : > { %v1075_v55 = vpop.f32.mrb[12].mxu1 }
 0x3f2   : > { %v1219_v56 = vpack.c.bf16 %v1075_v55, %v1075_v55  ;;  %v1939_v57 = vpop.f32.mrb[13].mxu1 }
 0x3f3   : > { %v1078_v59 = vpop.f32.mrb[14].mxu1 }
 0x3f4   : > { %v1940_v60 = vpop.f32.mrb[15].mxu1  ;;  %1962 = vmatmul.mubr.msk.bf16.vlgmr.msra.gmra.mrb[20].mxu1 %vm797_vm3, %v1219_v56 }
 0x3f5   : > { %1966 = vmatpush3.bf16.msra.mxu1 %v1275_v58  ;;  %1967 = vmatprep.mubr.msk.bf16.mxu1 %vm2228_vm0, %v2227_v1 }
 0x3f6   : > { %1971 = vmatprep.subr.bf16.mxu1 %v2227_v1 }
 0x465   : > { %v1121_v62 = vpop.f32.mrb[16].mxu0 }
 0x466   : > { %v1268_v63 = vpack.c.bf16 %v1121_v62, %v1121_v62  ;;  %v1945_v0 = vpop.f32.mrb[17].mxu0 }
 0x467   : > { %v1124_v3 = vpop.f32.mrb[18].mxu0 }
 0x468   : > { %v1946_v4 = vpop.f32.mrb[19].mxu0  ;;  %1968 = vmatmul.mubr.msk.bf16.vlgmr.msra.gmra.mrb[20].mxu1 %vm797_vm3, %v1268_v63 }
 0x469   : > { %1972 = vmatpush3.bf16.msra.mxu1 %v1325_v2  ;;  %1973 = vmatprep.mubr.msk.bf16.mxu1 %vm2228_vm0, %v2227_v1 }
 0x46a   : > { %1977 = vmatprep.subr.bf16.mxu1 %v2227_v1 }
 0x46e   : > { %v1213_v6 = vpop.f32.mrb[20].mxu0 }
 0x46f   : > { %v1167_v7 = vpop.f32.mrb[16].mxu1  ;;  %v1957_v8 = vpop.f32.mrb[21].mxu0  ;;  %v1368_v17 = vpack.c.bf16 %v1213_v6, %v1213_v6 }
 0x470   : > { %v1951_v10 = vpop.f32.mrb[17].mxu1  ;;  %v1216_v11 = vpop.f32.mrb[22].mxu0  ;;  %v1318_v14 = vpack.c.bf16 %v1167_v7, %v1167_v7 }
 0x471   : > { %v1170_v12 = vpop.f32.mrb[18].mxu1  ;;  %v1958_v13 = vpop.f32.mrb[23].mxu0 }
 0x472   : > { %v1952_v15 = vpop.f32.mrb[19].mxu1 }
 0x474   : > { %1974 = vmatmul.mubr.msk.bf16.vlgmr.msra.gmra.mrb[20].mxu1 %vm797_vm3, %v1318_v14 }
 0x475   : > { %1978 = vmatpush3.bf16.msra.mxu1 %v1375_v16  ;;  %1979 = vmatprep.mubr.msk.bf16.mxu1 %vm2228_vm0, %v2227_v1 }
 0x480   : > { %1980 = vmatmul.mubr.msk.bf16.vlgmr.msra.gmra.mrb[20].mxu1 %vm797_vm3, %v1368_v17 }
 0x553   : > { %v1411_v18 = vpop.f32.mrb[20].mxu1 }
 0x554   : > { %v2003_v19 = vadd.f32 %v1411_v18, %v2399_v5  ;;  %v1981_v20 = vpop.f32.mrb[21].mxu1  ;;  %v2090_v5 = vld [vmem:[%s2684_s8 + $0x8] sm:$0xff]  }
 0x555   : > { %v1414_v21 = vpop.f32.mrb[22].mxu1  ;;  %1986 = vmatpush3.bf16.msra.mxu0 %v2090_v5 }
 0x556   : > { %v1982_v23 = vpop.f32.mrb[23].mxu1  ;;  %v1418_v24 = vsel %vm568_vm1, %v2003_v19, 0.0  ;;  %1991 = vmatprep.subr.bf16.mxu0 %v2227_v1 }
 0x557   : > { %1419 = vadd.xlane.f32.xlu1 %v1418_v24 }
 0x5e4   : > { %v1420_v25 = vpop.xlane.xlu1 %1419 }
 0x5e5   : > { %v1422_v26 = vmul.f32 0.03125, %v1420_v25 }
 0x5e7   : > { %v1423_v27 = vsub.f32 %v2003_v19, %v1422_v26 }
 0x5e9   : > { %v1424_v28 = vmul.f32 %v1423_v27, %v1423_v27 }
 0x5eb   : > { %v1425_v29 = vsel %vm568_vm1, %v1424_v28, 0.0 }
 0x5ec   : > { %1426 = vadd.xlane.f32.xlu0 %v1425_v29 }
 0x679   : > { %v1427_v31 = vpop.xlane.xlu0 %1426 }
 0x67a   : > { %v1428_v32 = vmul.f32 0.03125, %v1427_v31 }
 0x67c   : > { %v1429_v22 = vadd.f32 1e-06, %v1428_v32 }
 0x67e   : > { %2111 = vrsqrt.f32 %v1429_v22 }
 0x688   : > { %v2112_v33 = vpop.eup %2111 }
 0x689   : > { %v1431_v35 = vmul.f32 %v2112_v33, %v1423_v27 }
 0x68b   : > { %v1439_v37 = vmul.f32 %v1822_v34, %v1431_v35 }
 0x68d   : > { %v1447_v38 = vadd.f32 %v1823_v36, %v1439_v37 }
 0x68f   : > { %v1448_v40 = vpack.c.bf16 %v1447_v38, %v1447_v38 }
 0x691   : > { %1988 = vmatmul.mubr.msk.bf16.vlgmr.msra.gmra.mrb[24].mxu0 %vm568_vm1, %v1448_v40 }
 0x692   : > { %1992 = vmatpush3.bf16.msra.mxu0 %v2091_v39  ;;  %1999 = vmatprep.mubr.msk.bf16.mxu0 %vm2228_vm0, %v2227_v1 }
 0x693   : > { %1993 = vmatprep.subr.bf16.mxu0 %v2227_v1 }
 0x696   : > { %1994 = vmatpush3.bf16.msra.mxu0 %v2092_v41 }
 0x697   : > { %1995 = vmatprep.subr.bf16.mxu0 %v2227_v1 }
 0x69a   : > { %1996 = vmatpush3.bf16.msra.mxu0 %v2093_v42 }
 0x69b   : > { %1997 = vmatprep.subr.bf16.mxu0 %v2227_v1  ;;  %v1828_v1 = vld [vmem:[%s2687_s11] ss:$0 sm:$0xff] }
 0x69e   : > { %1998 = vmatpush3.bf16.msra.mxu0 %v2094_v43 }
 0x764   : > { %v1509_v45 = vpop.f32.mrb[24].mxu0 }
 0x765   : > { %v1510_v46 = vadd.f32 %v1824_v44, %v1509_v45  ;;  %v1989_v47 = vpop.f32.mrb[25].mxu0 }
 0x766   : > { %v1512_v48 = vpop.f32.mrb[26].mxu0 }
 0x767   : > { %v1515_v49 = vmax.f32 %v1510_v46, 0.0  ;;  %v1990_v50 = vpop.f32.mrb[27].mxu0 }
 0x769   : > { %v1516_v51 = vpack.c.bf16 %v1515_v49, %v1515_v49 }
 0x76b   : > { %2000 = vmatmul.mubr.msk.bf16.vlgmr.msra.gmra.mrb[28].mxu0 %vm1556_vm5, %v1516_v51 }
 0x83e   : > { %v1594_v52 = vpop.f32.mrb[28].mxu0 }
 0x83f   : > { %v1595_v53 = vadd.f32 %v1828_v1, %v1594_v52  ;;  %v2001_v54 = vpop.f32.mrb[29].mxu0 }
 0x840   : > { %v1597_v55 = vpop.f32.mrb[30].mxu0 }
 0x841   : > { %v2002_v56 = vpop.f32.mrb[31].mxu0  ;;  %v1600_v57 = vadd.f32 %v1595_v53, %v1447_v38 }
 0x843   : > { %v1601_v58 = vsel %vm568_vm1, %v1600_v57, 0.0 }
 0x844   : > { %1602 = vadd.xlane.f32.xlu0 %v1601_v58 }
 0x8d1   : > { %v1603_v59 = vpop.xlane.xlu0 %1602 }
 0x8d2   : > { %v1604_v60 = vmul.f32 0.03125, %v1603_v59 }
 0x8d4   : > { %v1605_v61 = vsub.f32 %v1600_v57, %v1604_v60 }
 0x8d6   : > { %v1606_v62 = vmul.f32 %v1605_v61, %v1605_v61 }
 0x8d8   : > { %v1607_v63 = vsel %vm568_vm1, %v1606_v62, 0.0 }
 0x8d9   : > { %1608 = vadd.xlane.f32.xlu1 %v1607_v63 }
 0x8da   : > { %2128 = shalt.err (!%p2125_p5)
}
 0x8db   : > { %s2129_s26 = scalar_lea.hbm %s2590_s0, 512  ;;  %s2133_s17 = scalar_lea.hbm %s2691_s15, 1024 }
 0x8dc   : > { %p2130_p6 = scmp.ne.s32.totalorder %s2590_s0, %s2129_s26  ;;  %p2134_p10 = scmp.lt.u32.totalorder %s2590_s0, %s2691_s15 }
 0x8dd   : > { %p2135_p11 = scmp.lt.u32.totalorder %s2133_s17, %s2129_s26  ;;  %p2137_p13 = scmp.lt.u32.totalorder %s2129_s26, %s2590_s0 }
 0x8de   : > { %p2131_p7 = pnand %p2130_p6, %p2356_p4 }
 0x8df   : > { %p2136_p12 = por %p2135_p11, %p2134_p10 }
 0x8e0   : > { %p2132_p9 = pneg %p2131_p7 }
 0x8e1   : > { %p2138_p0 = por %p2137_p13, %p2136_p12 }
 0x8e3   : > { %p2139_p1 = pnand %p2138_p0, %p2132_p9 }
 0x8e5   : > { %2142 = shalt.err (!%p2139_p1)
}
 0x8e6   : > { %s2233_s3 = smov 128   ;;  %s2234_s29 = smov 8   ;;  %v1834_v6 = vld [vmem:[%s2688_s12] ss:$0 sm:$0xff] }
 0x8e7   : > { %s2709_s16 = scalar_lea.sflag [#allocation7], %s2477_s27  ;;  %s1792_s25 = sshll.u32 %s2477_s27, 3  ;;  %v1835_v8 = vld [vmem:[%s2689_s13] ss:$0 sm:$0xff] }
 0x8e8   : > { %2017 = dma.vmem_to_hbm [thread:$0]  (%p2356_p4), %s2585_s22, 512, %s2590_s0, %s2709_s16, %s2233_s3, %s2233_s3, %s2234_s29  }
 0x8e9   : > { %s1838_s2 = sshll.u32 %s2217_s21, 7  ;;  %s526_s4 = scalar_lea.vmem [#allocation4], %s1792_s25 }
 0x8ea   : > { %s1651_s22 = sshll.u32 %s526_s4, 4  ;;  %s2627_s29 = scalar_lea.hbm %s2690_s14, %s1838_s2  ;;  %s2629_s22 = int_to_ptr.vmem [resolvable:$true] %s1651_s22 }
 0x8eb   : > { %s1632_s16 = scalar_lea.sflag [#allocation5], %s2477_s27  ;;  %s2143_s26 = scalar_lea.vmem %s2629_s22, 128 }
 0x8ec   : > { %p2144_p2 = scmp.ne.s32.totalorder %s2629_s22, %s2143_s26  ;;  %s2235_s21 = smov [#allocation4]  }
 0x8ed   : > { %s2147_s25 = sshll.u32 %s2235_s21, 4  ;;  %s2148_s25 = int_to_ptr.vmem [resolvable:$false] %s2147_s25 }
 0x8ee   : > { %p2145_p3 = pnand %p2144_p2, %p2356_p4  ;;  %s2149_s24 = scalar_lea.vmem %s2148_s25, 256 }
 0x8ef   : > { %p2150_p6 = scmp.lt.s32.totalorder %s2629_s22, %s2148_s25  ;;  %p2151_p7 = scmp.lt.s32.totalorder %s2149_s24, %s2143_s26 }
 0x8f0   : > { %p2146_p5 = pneg %p2145_p3 }
 0x8f1   : > { %p2152_p9 = por %p2151_p7, %p2150_p6 }
 0x8f3   : > { %p2153_p10 = pnand %p2152_p9, %p2146_p5 }
 0x966   : > { %v1609_v0 = vpop.xlane.xlu1 %1608 }
 0x967   : > { %v1610_v2 = vmul.f32 0.03125, %v1609_v0 }
 0x969   : > { %v1611_v3 = vadd.f32 1e-06, %v1610_v2 }
 0x96b   : > { %2113 = vrsqrt.f32 %v1611_v3 }
 0x975   : > { %v2114_v4 = vpop.eup %2113 }
 0x976   : > { %v1613_v7 = vmul.f32 %v2114_v4, %v1605_v61 }
 0x978   : > { %v1621_v9 = vmul.f32 %v1834_v6, %v1613_v7 }
 0x97a   : > { %v1629_v10 = vadd.f32 %v1835_v8, %v1621_v9 }
 0x97c   : > { %1630 = vst.msk [vmem:[%s526_s4] sm:$0xff] %vm568_vm1, %v1629_v10 }
 0x97d   : > { %2156 = shalt.err (!%p2153_p10)
}
 0x97e   : > { %s2157_s2 = scalar_lea.hbm %s2627_s29, 128  ;;  %s2161_s17 = scalar_lea.hbm %s2690_s14, 256 }
 0x97f   : > { %p2158_p11 = scmp.ne.s32.totalorder %s2627_s29, %s2157_s2  ;;  %p2162_p0 = scmp.lt.u32.totalorder %s2627_s29, %s2690_s14 }
 0x980   : > { %p2163_p1 = scmp.lt.u32.totalorder %s2161_s17, %s2157_s2  ;;  %p2165_p3 = scmp.lt.u32.totalorder %s2157_s2, %s2627_s29 }
 0x981   : > { %p2159_p12 = pnand %p2158_p11, %p2356_p4 }
 0x982   : > { %p2164_p2 = por %p2163_p1, %p2162_p0 }
 0x983   : > { %p2160_p13 = pneg %p2159_p12 }
 0x984   : > { %p2166_p5 = por %p2165_p3, %p2164_p2 }
 0x986   : > { %p2167_p6 = pnand %p2166_p5, %p2160_p13 }
 0x988   : > { %2170 = shalt.err (!%p2167_p6)
}
 0x989   : > { %2016 = dma.vmem_to_hbm [thread:$0]  (%p2356_p4), %s2629_s22, 128, %s2627_s29, %s1632_s16  }
 0x98a PF: > { %p2027_p7 = scmp.ge.s32.totalorder %s2225_s23, 2  ;;  %s1680_s3 = sand.u32 1, %s2205_s18  }
 0x98b   : > { %s1681_s26 = scalar_lea.sflag [#allocation5], %s1680_s3 }
 0x98c   : > { %p2021_p9 = pnand %p2027_p7, %p2363_p8 }
 0x98e   : > { %2196 = dma.done.wait (!%p2021_p9), %s1681_s26, 128  }
 0x98f   : > { %2198 = vsyncadd (!%p2021_p9), %s1681_s26, 4294967168  ;;  %s1690_s21 = scalar_lea.sflag [#allocation7], %s1680_s3 }
 0x990   : > { %2200 = dma.done.wait (!%p2021_p9), %s1690_s21, 512  }
 0x991   : > { %2202 = vsyncadd (!%p2021_p9), %s1690_s21, 4294966784  ;;  %s32_s23 = sadd.s32 1, %s2225_s23   ;;  %s2710_s28 = sld [smem:[#allocation12_spill]] }
 0x992   : > { %p29_p10 = scmp.ge.s32.totalorder %s32_s23, 4   ;;  %s2711_s21 = sld [smem:[#allocation10_spill]] }
 0x993   : > { %s2712_s22 = sld [smem:[#allocation11_spill]]  ;;  %s2713_s18 = smov %s2209_s19 }
 0x994   : > { %s2714_s19 = smov %s2213_s20  ;;  %31 = sbr.rel (!%p29_p10) target bundleno = 12 (0xc), region = 145 }
 0x997   : > { %s2715_s20 = smov %s2710_s28 }
 0x99b   :  { %1695 = vsyncpa [#allocation5], 1 }
 0x99c   :  { %1697 = vsyncpa [#allocation5 + $0x1], 1 }
 0x99d   :  { %1698 = vsyncpa [#allocation7], 1 }
 0x99e   :  { %1700 = vsyncpa [#allocation7 + $0x1], 1 }

</bundles_post_ra>
